<compile_context>
chip_gen: v7x
topology: tpu7x:2x2x1
jax: 0.10.0
libtpu: 0.0.40
codegen_flags: <defaults>
</compile_context>

<pallas_src>
import jax
import jax.numpy as jnp
from jax.experimental import pallas as pl
from jax.experimental.pallas import tpu as pltpu

IMG = 28 * 28       # 784
LATENT = 3
LATENT_PAD = 128    # lane-dense padded width for the encoder output


def autoencoder_kernel(
    x_ref,
    w1_ref, b1_ref, w2_ref, b2_ref, w3_ref, b3_ref, w4_ref, b4_ref,
    w5_ref, b5_ref, w6_ref, b6_ref, w7_ref, b7_ref, w8_ref, b8_ref,
    enc_ref, dec_ref,
):
    def linear(h, w_ref, b_ref):
        w = w_ref[...]
        # Cast only the matmul operands to the (possibly bf16) weight dtype;
        # accumulation is f32 and the bias add / activations stay f32.
        return (
            jnp.dot(h.astype(w.dtype), w, preferred_element_type=jnp.float32)
            + b_ref[...].astype(jnp.float32)
        )

    # encoder: Linear -> Tanh -> Linear -> Tanh -> Linear -> Tanh -> Linear
    h = jnp.tanh(linear(x_ref[...], w1_ref, b1_ref))
    h = jnp.tanh(linear(h, w2_ref, b2_ref))
    h = jnp.tanh(linear(h, w3_ref, b3_ref))
    encoded = linear(h, w4_ref, b4_ref)          # (tile, 128); cols 3: are exact zeros

    # decoder: Linear -> Tanh -> Linear -> Tanh -> Linear -> Tanh -> Linear -> Sigmoid
    h = jnp.tanh(linear(encoded, w5_ref, b5_ref))
    h = jnp.tanh(linear(h, w6_ref, b6_ref))
    h = jnp.tanh(linear(h, w7_ref, b7_ref))
    z = linear(h, w8_ref, b8_ref)
    if dec_ref.dtype == jnp.bfloat16:
        # bf16 EUP sigmoid keeps the 784-wide transcendental off the critical
        # path on v6e/v7x when the caller asked for a bf16 decoded output.
        z = z.astype(jnp.bfloat16)
    decoded = jax.nn.sigmoid(z)

    enc_ref[...] = encoded.astype(enc_ref.dtype)
    dec_ref[...] = decoded.astype(dec_ref.dtype)


def _pad_params_for_lane_density(params):
    """Zero-pad W4/b4 to 128 output columns and W5 to 128 input rows.

    encoded[:, 3:] becomes exactly zero and the zero rows of W5 contribute
    nothing, so the forward pass is mathematically unchanged while the encoder
    output store becomes lane-dense (unmasked vst).
    """
    padded = list(params)
    w4, b4 = params[3]
    w5, b5 = params[4]
    w4p = jnp.zeros((w4.shape[0], LATENT_PAD), w4.dtype).at[:, :LATENT].set(w4)
    b4p = jnp.zeros((1, LATENT_PAD), b4.dtype).at[:, :LATENT].set(b4)
    w5p = jnp.zeros((LATENT_PAD, w5.shape[1]), w5.dtype).at[:LATENT, :].set(w5)
    padded[3] = (w4p, b4p)
    padded[4] = (w5p, b5)
    return padded


def _round_down(v, m):
    return max(m, (v // m) * m)


def _round_up(v, m):
    return -(-v // m) * m


def autoencoder_forward(
    x,
    params,
    *,
    batch_tile=512,
    param_dtype=jnp.bfloat16,
    enc_dtype=None,
    dec_dtype=None,
    vmem_limit_bytes=32 * 1024 * 1024,
):
    """x: (B, 784). params: list of (W, b) with W (in, out), b (1, out).

    batch_tile is the main perf knob (256-512 recommended; the kernel is
    HBM-streaming bound).  Keep batch_tile<=512 / vmem_limit<=~48 MiB on v7x
    (64 MiB VMEM per TensorCore); v5e/v6e (128 MiB VMEM) may opt into
    batch_tile=1024 / vmem_limit=64 MiB for a marginal (~1-3%) gain.
    param_dtype=jnp.bfloat16 (default) runs the matmuls on the native bf16 MXU
    path with f32 accumulation; pass param_dtype=None for exact f32 weights.
    enc_dtype/dec_dtype default to x.dtype; pass jnp.bfloat16 to shrink HBM
    output traffic in this HBM-bound kernel.
    """
    B, D = x.shape
    assert D == IMG

    enc_dtype = x.dtype if enc_dtype is None else jnp.dtype(enc_dtype)
    dec_dtype = x.dtype if dec_dtype is None else jnp.dtype(dec_dtype)

    if param_dtype is not None:
        # bf16 weights halve weight traffic / enable the native bf16 MXU path;
        # biases and all elementwise math remain f32.
        params = [(w.astype(param_dtype), b) for w, b in params]

    params = _pad_params_for_lane_density(params)

    # Sublane alignment: 8 rows for f32, 16 for any 16-bit (packed) I/O.
    align = 8
    for dt in (x.dtype, enc_dtype, dec_dtype):
        if jnp.dtype(dt).itemsize == 2:
            align = 16

    # Clamp the batch tile to the (aligned) batch and, when the batch allows,
    # force >= 2 grid steps so v7x's two TensorCores both get work under
    # dimension_semantics=("parallel",).  Pad B up to a tile multiple.
    bt = _round_down(min(batch_tile, B), align)
    if B > align:
        bt = min(bt, _round_up(-(-B // 2), align))
    n_tiles = -(-B // bt)
    Bp = n_tiles * bt
    xp = x if Bp == B else jnp.pad(x, ((0, Bp - B), (0, 0)))

    flat_params = []
    in_specs = [pl.BlockSpec((bt, D), lambda i: (i, 0))]
    for w, b in params:
        flat_params += [w, b]
        # Constant full-array blocks: single-buffer them (no re-DMA happens, so
        # double-buffering would only waste VMEM that batch_tile can use).
        in_specs.append(
            pl.BlockSpec(w.shape, lambda i: (0, 0),
                         pipeline_mode=pl.Buffered(buffer_count=1)))
        in_specs.append(
            pl.BlockSpec(b.shape, lambda i: (0, 0),
                         pipeline_mode=pl.Buffered(buffer_count=1)))

    out_specs = [
        pl.BlockSpec((bt, LATENT_PAD), lambda i: (i, 0)),
        pl.BlockSpec((bt, D), lambda i: (i, 0)),
    ]

    # Advisory cost hint for XLA scheduling around the custom call.
    flops = 2 * Bp * sum(int(w.shape[0]) * int(w.shape[1]) for w, _ in params)
    transcendentals = Bp * (128 + 64 + 12 + 12 + 64 + 128 + IMG)
    bytes_accessed = (
        Bp * D * x.dtype.itemsize
        + Bp * LATENT_PAD * jnp.dtype(enc_dtype).itemsize
        + Bp * D * jnp.dtype(dec_dtype).itemsize
        + sum(w.size * w.dtype.itemsize + b.size * b.dtype.itemsize
              for w, b in params)
    )
    cost = pl.CostEstimate(
        flops=flops,
        transcendentals=transcendentals,
        bytes_accessed=bytes_accessed,
    )

    enc, dec = pl.pallas_call(
        autoencoder_kernel,
        out_shape=(
            jax.ShapeDtypeStruct((Bp, LATENT_PAD), enc_dtype),
            jax.ShapeDtypeStruct((Bp, D), dec_dtype),
        ),
        grid_spec=pltpu.PrefetchScalarGridSpec(
            num_scalar_prefetch=0,
            grid=(n_tiles,),
            in_specs=in_specs,
            out_specs=out_specs,
        ),
        compiler_params=pltpu.CompilerParams(
            dimension_semantics=("parallel",),
            vmem_limit_bytes=vmem_limit_bytes,
        ),
        cost_estimate=cost,
    )(xp, *flat_params)

    return enc[:B, :LATENT], dec[:B]


def init_params(key):
    """Weight (in, out), bias (1, out); PyTorch-style U(-1/sqrt(in), 1/sqrt(in))."""
    dims = [IMG, 128, 64, 12, 3, 12, 64, 128, IMG]
    params = []
    for fan_in, fan_out in zip(dims[:-1], dims[1:]):
        key, kw, kb = jax.random.split(key, 3)
        bound = 1.0 / jnp.sqrt(fan_in)
        w = jax.random.uniform(kw, (fan_in, fan_out), jnp.float32, -bound, bound)
        b = jax.random.uniform(kb, (1, fan_out), jnp.float32, -bound, bound)
        params.append((w, b))
    return params


def reference_forward(x, params):
    h = x
    enc = None
    for idx, (w, b) in enumerate(params):
        h = h @ w + b
        if idx == 3:
            enc = h            # end of encoder, no activation
        elif idx == 7:
            h = jax.nn.sigmoid(h)
        else:
            h = jnp.tanh(h)
    return enc, h


if __name__ == "__main__":
    key = jax.random.PRNGKey(0)
    key, kx = jax.random.split(key)

    # Small deterministic example batch.
    B = 8
    x = jax.random.uniform(kx, (B, IMG), jnp.float32)
    params = init_params(key)
    enc_ref, dec_ref = reference_forward(x, params)

    # 1) Exact f32-weight path (tight tolerance).
    enc, dec = autoencoder_forward(x, params, param_dtype=None)
    enc, dec = jax.block_until_ready((enc, dec))
    assert enc.shape == (B, LATENT) and dec.shape == (B, IMG)
    assert jnp.allclose(enc, enc_ref, atol=1e-5, rtol=1e-5)
    assert jnp.allclose(dec, dec_ref, atol=1e-5, rtol=1e-5)

    # 2) Default bf16-weight MXU path (looser tolerance for bf16 operands).
    enc_b, dec_b = autoencoder_forward(x, params)
    enc_b, dec_b = jax.block_until_ready((enc_b, dec_b))
    assert jnp.allclose(enc_b, enc_ref, atol=5e-2, rtol=5e-2)
    assert jnp.allclose(dec_b, dec_ref, atol=3e-2, rtol=3e-2)

    # 3) Multi-step grid + batch padding + bf16 outputs (B not a tile multiple).
    key, kx2 = jax.random.split(key)
    B2 = 40
    x2 = jax.random.uniform(kx2, (B2, IMG), jnp.float32)
    enc2, dec2 = autoencoder_forward(
        x2, params, batch_tile=16,
        enc_dtype=jnp.bfloat16, dec_dtype=jnp.bfloat16)
    enc2, dec2 = jax.block_until_ready((enc2, dec2))
    enc2_ref, dec2_ref = reference_forward(x2, params)
    assert enc2.dtype == jnp.bfloat16 and dec2.dtype == jnp.bfloat16
    assert jnp.allclose(enc2.astype(jnp.float32), enc2_ref, atol=8e-2, rtol=8e-2)
    assert jnp.allclose(dec2.astype(jnp.float32), dec2_ref, atol=5e-2, rtol=5e-2)

    print("KERNEL_OK")
</pallas_src>

<mosaic_0001>
module attributes {stable_mosaic.version = 11 : i64} {
  func.func @autoencoder_kernel(%arg0: i32, %arg1: memref<8x784xf32, #tpu.memory_space<vmem>>, %arg2: memref<784x128xf32, #tpu.memory_space<vmem>>, %arg3: memref<1x128xf32, #tpu.memory_space<vmem>>, %arg4: memref<128x64xf32, #tpu.memory_space<vmem>>, %arg5: memref<1x64xf32, #tpu.memory_space<vmem>>, %arg6: memref<64x12xf32, #tpu.memory_space<vmem>>, %arg7: memref<1x12xf32, #tpu.memory_space<vmem>>, %arg8: memref<12x128xf32, #tpu.memory_space<vmem>>, %arg9: memref<1x128xf32, #tpu.memory_space<vmem>>, %arg10: memref<128x12xf32, #tpu.memory_space<vmem>>, %arg11: memref<1x12xf32, #tpu.memory_space<vmem>>, %arg12: memref<12x64xf32, #tpu.memory_space<vmem>>, %arg13: memref<1x64xf32, #tpu.memory_space<vmem>>, %arg14: memref<64x128xf32, #tpu.memory_space<vmem>>, %arg15: memref<1x128xf32, #tpu.memory_space<vmem>>, %arg16: memref<128x784xf32, #tpu.memory_space<vmem>>, %arg17: memref<1x784xf32, #tpu.memory_space<vmem>>, %arg18: memref<8x128xf32, #tpu.memory_space<vmem>>, %arg19: memref<8x784xf32, #tpu.memory_space<vmem>>) attributes {dimension_semantics = [#tpu.dimension_semantics<parallel>], iteration_bounds = array<i64: 1>, scalar_prefetch = 0 : i64, scratch_operands = 0 : i64, tpu.core_type = #tpu.core_type<tc>, window_params = [{transform_indices = @transform_0, window_bounds = array<i64: 8, 784>}, {pipeline_mode = #tpu.pipeline_mode<synchronous>, transform_indices = @transform_1, window_bounds = array<i64: 784, 128>}, {pipeline_mode = #tpu.pipeline_mode<synchronous>, transform_indices = @transform_2, window_bounds = array<i64: 1, 128>}, {pipeline_mode = #tpu.pipeline_mode<synchronous>, transform_indices = @transform_3, window_bounds = array<i64: 128, 64>}, {pipeline_mode = #tpu.pipeline_mode<synchronous>, transform_indices = @transform_4, window_bounds = array<i64: 1, 64>}, {pipeline_mode = #tpu.pipeline_mode<synchronous>, transform_indices = @transform_5, window_bounds = array<i64: 64, 12>}, {pipeline_mode = #tpu.pipeline_mode<synchronous>, transform_indices = @transform_6, window_bounds = array<i64: 1, 12>}, {pipeline_mode = #tpu.pipeline_mode<synchronous>, transform_indices = @transform_7, window_bounds = array<i64: 12, 128>}, {pipeline_mode = #tpu.pipeline_mode<synchronous>, transform_indices = @transform_8, window_bounds = array<i64: 1, 128>}, {pipeline_mode = #tpu.pipeline_mode<synchronous>, transform_indices = @transform_9, window_bounds = array<i64: 128, 12>}, {pipeline_mode = #tpu.pipeline_mode<synchronous>, transform_indices = @transform_10, window_bounds = array<i64: 1, 12>}, {pipeline_mode = #tpu.pipeline_mode<synchronous>, transform_indices = @transform_11, window_bounds = array<i64: 12, 64>}, {pipeline_mode = #tpu.pipeline_mode<synchronous>, transform_indices = @transform_12, window_bounds = array<i64: 1, 64>}, {pipeline_mode = #tpu.pipeline_mode<synchronous>, transform_indices = @transform_13, window_bounds = array<i64: 64, 128>}, {pipeline_mode = #tpu.pipeline_mode<synchronous>, transform_indices = @transform_14, window_bounds = array<i64: 1, 128>}, {pipeline_mode = #tpu.pipeline_mode<synchronous>, transform_indices = @transform_15, window_bounds = array<i64: 128, 784>}, {pipeline_mode = #tpu.pipeline_mode<synchronous>, transform_indices = @transform_16, window_bounds = array<i64: 1, 784>}, {transform_indices = @transform_17, window_bounds = array<i64: 8, 128>}, {transform_indices = @transform_18, window_bounds = array<i64: 8, 784>}]} {
    %c0 = arith.constant 0 : index
    %c0_0 = arith.constant 0 : index
    %0 = vector.load %arg1[%c0, %c0_0] : memref<8x784xf32, #tpu.memory_space<vmem>>, vector<8x784xf32>
    %c0_1 = arith.constant 0 : index
    %c0_2 = arith.constant 0 : index
    %1 = vector.load %arg2[%c0_1, %c0_2] : memref<784x128xf32, #tpu.memory_space<vmem>>, vector<784x128xf32>
    %cst = arith.constant dense<0.000000e+00> : vector<8x128xf32>
    %2 = tpu.matmul %0, %1, %cst {dimension_numbers = #tpu.dot_dimension_numbers<[1], [0], [0], [1], [0, 0, 1, 1], [], []>} : vector<8x784xf32>, vector<784x128xf32>, vector<8x128xf32> -> vector<8x128xf32>
    %c0_3 = arith.constant 0 : index
    %c0_4 = arith.constant 0 : index
    %3 = vector.load %arg3[%c0_3, %c0_4] : memref<1x128xf32, #tpu.memory_space<vmem>>, vector<1x128xf32>
    %4 = vector.broadcast %3 : vector<1x128xf32> to vector<8x128xf32>
    %5 = arith.addf %2, %4 : vector<8x128xf32>
    %6 = math.tanh %5 : vector<8x128xf32>
    %c0_5 = arith.constant 0 : index
    %c0_6 = arith.constant 0 : index
    %7 = vector.load %arg4[%c0_5, %c0_6] : memref<128x64xf32, #tpu.memory_space<vmem>>, vector<128x64xf32>
    %cst_7 = arith.constant dense<0.000000e+00> : vector<8x64xf32>
    %8 = tpu.matmul %6, %7, %cst_7 {dimension_numbers = #tpu.dot_dimension_numbers<[1], [0], [0], [1], [0, 0, 1, 1], [], []>} : vector<8x128xf32>, vector<128x64xf32>, vector<8x64xf32> -> vector<8x64xf32>
    %c0_8 = arith.constant 0 : index
    %c0_9 = arith.constant 0 : index
    %9 = vector.load %arg5[%c0_8, %c0_9] : memref<1x64xf32, #tpu.memory_space<vmem>>, vector<1x64xf32>
    %10 = vector.broadcast %9 : vector<1x64xf32> to vector<8x64xf32>
    %11 = arith.addf %8, %10 : vector<8x64xf32>
    %12 = math.tanh %11 : vector<8x64xf32>
    %c0_10 = arith.constant 0 : index
    %c0_11 = arith.constant 0 : index
    %13 = vector.load %arg6[%c0_10, %c0_11] : memref<64x12xf32, #tpu.memory_space<vmem>>, vector<64x12xf32>
    %cst_12 = arith.constant dense<0.000000e+00> : vector<8x12xf32>
    %14 = tpu.matmul %12, %13, %cst_12 {dimension_numbers = #tpu.dot_dimension_numbers<[1], [0], [0], [1], [0, 0, 1, 1], [], []>} : vector<8x64xf32>, vector<64x12xf32>, vector<8x12xf32> -> vector<8x12xf32>
    %c0_13 = arith.constant 0 : index
    %c0_14 = arith.constant 0 : index
    %15 = vector.load %arg7[%c0_13, %c0_14] : memref<1x12xf32, #tpu.memory_space<vmem>>, vector<1x12xf32>
    %16 = vector.broadcast %15 : vector<1x12xf32> to vector<8x12xf32>
    %17 = arith.addf %14, %16 : vector<8x12xf32>
    %18 = math.tanh %17 : vector<8x12xf32>
    %c0_15 = arith.constant 0 : index
    %c0_16 = arith.constant 0 : index
    %19 = vector.load %arg8[%c0_15, %c0_16] : memref<12x128xf32, #tpu.memory_space<vmem>>, vector<12x128xf32>
    %cst_17 = arith.constant dense<0.000000e+00> : vector<8x128xf32>
    %20 = tpu.matmul %18, %19, %cst_17 {dimension_numbers = #tpu.dot_dimension_numbers<[1], [0], [0], [1], [0, 0, 1, 1], [], []>} : vector<8x12xf32>, vector<12x128xf32>, vector<8x128xf32> -> vector<8x128xf32>
    %c0_18 = arith.constant 0 : index
    %c0_19 = arith.constant 0 : index
    %21 = vector.load %arg9[%c0_18, %c0_19] : memref<1x128xf32, #tpu.memory_space<vmem>>, vector<1x128xf32>
    %22 = vector.broadcast %21 : vector<1x128xf32> to vector<8x128xf32>
    %23 = arith.addf %20, %22 : vector<8x128xf32>
    %c0_20 = arith.constant 0 : index
    %c0_21 = arith.constant 0 : index
    %24 = vector.load %arg10[%c0_20, %c0_21] : memref<128x12xf32, #tpu.memory_space<vmem>>, vector<128x12xf32>
    %cst_22 = arith.constant dense<0.000000e+00> : vector<8x12xf32>
    %25 = tpu.matmul %23, %24, %cst_22 {dimension_numbers = #tpu.dot_dimension_numbers<[1], [0], [0], [1], [0, 0, 1, 1], [], []>} : vector<8x128xf32>, vector<128x12xf32>, vector<8x12xf32> -> vector<8x12xf32>
    %c0_23 = arith.constant 0 : index
    %c0_24 = arith.constant 0 : index
    %26 = vector.load %arg11[%c0_23, %c0_24] : memref<1x12xf32, #tpu.memory_space<vmem>>, vector<1x12xf32>
    %27 = vector.broadcast %26 : vector<1x12xf32> to vector<8x12xf32>
    %28 = arith.addf %25, %27 : vector<8x12xf32>
    %29 = math.tanh %28 : vector<8x12xf32>
    %c0_25 = arith.constant 0 : index
    %c0_26 = arith.constant 0 : index
    %30 = vector.load %arg12[%c0_25, %c0_26] : memref<12x64xf32, #tpu.memory_space<vmem>>, vector<12x64xf32>
    %cst_27 = arith.constant dense<0.000000e+00> : vector<8x64xf32>
    %31 = tpu.matmul %29, %30, %cst_27 {dimension_numbers = #tpu.dot_dimension_numbers<[1], [0], [0], [1], [0, 0, 1, 1], [], []>} : vector<8x12xf32>, vector<12x64xf32>, vector<8x64xf32> -> vector<8x64xf32>
    %c0_28 = arith.constant 0 : index
    %c0_29 = arith.constant 0 : index
    %32 = vector.load %arg13[%c0_28, %c0_29] : memref<1x64xf32, #tpu.memory_space<vmem>>, vector<1x64xf32>
    %33 = vector.broadcast %32 : vector<1x64xf32> to vector<8x64xf32>
    %34 = arith.addf %31, %33 : vector<8x64xf32>
    %35 = math.tanh %34 : vector<8x64xf32>
    %c0_30 = arith.constant 0 : index
    %c0_31 = arith.constant 0 : index
    %36 = vector.load %arg14[%c0_30, %c0_31] : memref<64x128xf32, #tpu.memory_space<vmem>>, vector<64x128xf32>
    %cst_32 = arith.constant dense<0.000000e+00> : vector<8x128xf32>
    %37 = tpu.matmul %35, %36, %cst_32 {dimension_numbers = #tpu.dot_dimension_numbers<[1], [0], [0], [1], [0, 0, 1, 1], [], []>} : vector<8x64xf32>, vector<64x128xf32>, vector<8x128xf32> -> vector<8x128xf32>
    %c0_33 = arith.constant 0 : index
    %c0_34 = arith.constant 0 : index
    %38 = vector.load %arg15[%c0_33, %c0_34] : memref<1x128xf32, #tpu.memory_space<vmem>>, vector<1x128xf32>
    %39 = vector.broadcast %38 : vector<1x128xf32> to vector<8x128xf32>
    %40 = arith.addf %37, %39 : vector<8x128xf32>
    %41 = math.tanh %40 : vector<8x128xf32>
    %c0_35 = arith.constant 0 : index
    %c0_36 = arith.constant 0 : index
    %42 = vector.load %arg16[%c0_35, %c0_36] : memref<128x784xf32, #tpu.memory_space<vmem>>, vector<128x784xf32>
    %cst_37 = arith.constant dense<0.000000e+00> : vector<8x784xf32>
    %43 = tpu.matmul %41, %42, %cst_37 {dimension_numbers = #tpu.dot_dimension_numbers<[1], [0], [0], [1], [0, 0, 1, 1], [], []>} : vector<8x128xf32>, vector<128x784xf32>, vector<8x784xf32> -> vector<8x784xf32>
    %c0_38 = arith.constant 0 : index
    %c0_39 = arith.constant 0 : index
    %44 = vector.load %arg17[%c0_38, %c0_39] : memref<1x784xf32, #tpu.memory_space<vmem>>, vector<1x784xf32>
    %45 = vector.broadcast %44 : vector<1x784xf32> to vector<8x784xf32>
    %46 = arith.addf %43, %45 : vector<8x784xf32>
    %47 = arith.negf %46 : vector<8x784xf32>
    %48 = math.exp %47 : vector<8x784xf32>
    %cst_40 = arith.constant 1.000000e+00 : f32
    %49 = vector.broadcast %cst_40 : f32 to vector<8x784xf32>
    %50 = arith.addf %49, %48 : vector<8x784xf32>
    %51 = arith.divf %49, %50 : vector<8x784xf32>
    %c0_41 = arith.constant 0 : index
    %c0_42 = arith.constant 0 : index
    %52 = vector.load %arg18[%c0_41, %c0_42] : memref<8x128xf32, #tpu.memory_space<vmem>>, vector<8x128xf32>
    tpu.vector_store %arg18[%c0_41, %c0_42], %23 {strides = array<i32>} : memref<8x128xf32, #tpu.memory_space<vmem>>, vector<8x128xf32>,
    %c0_43 = arith.constant 0 : index
    %c0_44 = arith.constant 0 : index
    %53 = vector.load %arg19[%c0_43, %c0_44] : memref<8x784xf32, #tpu.memory_space<vmem>>, vector<8x784xf32>
    tpu.vector_store %arg19[%c0_43, %c0_44], %51 {strides = array<i32>} : memref<8x784xf32, #tpu.memory_space<vmem>>, vector<8x784xf32>,
    return
  }
  func.func @transform_0(%arg0: i32) -> (i32, i32) {
    %c0_i32 = arith.constant 0 : i32
    %c0_i32_0 = arith.constant 0 : i32
    return %arg0, %c0_i32 : i32, i32
  }
  func.func @transform_1(%arg0: i32) -> (i32, i32) {
    %c0_i32 = arith.constant 0 : i32
    %c0_i32_0 = arith.constant 0 : i32
    %c0_i32_1 = arith.constant 0 : i32
    return %c0_i32, %c0_i32_0 : i32, i32
  }
  func.func @transform_2(%arg0: i32) -> (i32, i32) {
    %c0_i32 = arith.constant 0 : i32
    %c0_i32_0 = arith.constant 0 : i32
    %c0_i32_1 = arith.constant 0 : i32
    return %c0_i32, %c0_i32_0 : i32, i32
  }
  func.func @transform_3(%arg0: i32) -> (i32, i32) {
    %c0_i32 = arith.constant 0 : i32
    %c0_i32_0 = arith.constant 0 : i32
    %c0_i32_1 = arith.constant 0 : i32
    return %c0_i32, %c0_i32_0 : i32, i32
  }
  func.func @transform_4(%arg0: i32) -> (i32, i32) {
    %c0_i32 = arith.constant 0 : i32
    %c0_i32_0 = arith.constant 0 : i32
    %c0_i32_1 = arith.constant 0 : i32
    return %c0_i32, %c0_i32_0 : i32, i32
  }
  func.func @transform_5(%arg0: i32) -> (i32, i32) {
    %c0_i32 = arith.constant 0 : i32
    %c0_i32_0 = arith.constant 0 : i32
    %c0_i32_1 = arith.constant 0 : i32
    return %c0_i32, %c0_i32_0 : i32, i32
  }
  func.func @transform_6(%arg0: i32) -> (i32, i32) {
    %c0_i32 = arith.constant 0 : i32
    %c0_i32_0 = arith.constant 0 : i32
    %c0_i32_1 = arith.constant 0 : i32
    return %c0_i32, %c0_i32_0 : i32, i32
  }
  func.func @transform_7(%arg0: i32) -> (i32, i32) {
    %c0_i32 = arith.constant 0 : i32
    %c0_i32_0 = arith.constant 0 : i32
    %c0_i32_1 = arith.constant 0 : i32
    return %c0_i32, %c0_i32_0 : i32, i32
  }
  func.func @transform_8(%arg0: i32) -> (i32, i32) {
    %c0_i32 = arith.constant 0 : i32
    %c0_i32_0 = arith.constant 0 : i32
    %c0_i32_1 = arith.constant 0 : i32
    return %c0_i32, %c0_i32_0 : i32, i32
  }
  func.func @transform_9(%arg0: i32) -> (i32, i32) {
    %c0_i32 = arith.constant 0 : i32
    %c0_i32_0 = arith.constant 0 : i32
    %c0_i32_1 = arith.constant 0 : i32
    return %c0_i32, %c0_i32_0 : i32, i32
  }
  func.func @transform_10(%arg0: i32) -> (i32, i32) {
    %c0_i32 = arith.constant 0 : i32
    %c0_i32_0 = arith.constant 0 : i32
    %c0_i32_1 = arith.constant 0 : i32
    return %c0_i32, %c0_i32_0 : i32, i32
  }
  func.func @transform_11(%arg0: i32) -> (i32, i32) {
    %c0_i32 = arith.constant 0 : i32
    %c0_i32_0 = arith.constant 0 : i32
    %c0_i32_1 = arith.constant 0 : i32
    return %c0_i32, %c0_i32_0 : i32, i32
  }
  func.func @transform_12(%arg0: i32) -> (i32, i32) {
    %c0_i32 = arith.constant 0 : i32
    %c0_i32_0 = arith.constant 0 : i32
    %c0_i32_1 = arith.constant 0 : i32
    return %c0_i32, %c0_i32_0 : i32, i32
  }
  func.func @transform_13(%arg0: i32) -> (i32, i32) {
    %c0_i32 = arith.constant 0 : i32
    %c0_i32_0 = arith.constant 0 : i32
    %c0_i32_1 = arith.constant 0 : i32
    return %c0_i32, %c0_i32_0 : i32, i32
  }
  func.func @transform_14(%arg0: i32) -> (i32, i32) {
    %c0_i32 = arith.constant 0 : i32
    %c0_i32_0 = arith.constant 0 : i32
    %c0_i32_1 = arith.constant 0 : i32
    return %c0_i32, %c0_i32_0 : i32, i32
  }
  func.func @transform_15(%arg0: i32) -> (i32, i32) {
    %c0_i32 = arith.constant 0 : i32
    %c0_i32_0 = arith.constant 0 : i32
    %c0_i32_1 = arith.constant 0 : i32
    return %c0_i32, %c0_i32_0 : i32, i32
  }
  func.func @transform_16(%arg0: i32) -> (i32, i32) {
    %c0_i32 = arith.constant 0 : i32
    %c0_i32_0 = arith.constant 0 : i32
    %c0_i32_1 = arith.constant 0 : i32
    return %c0_i32, %c0_i32_0 : i32, i32
  }
  func.func @transform_17(%arg0: i32) -> (i32, i32) {
    %c0_i32 = arith.constant 0 : i32
    %c0_i32_0 = arith.constant 0 : i32
    return %arg0, %c0_i32 : i32, i32
  }
  func.func @transform_18(%arg0: i32) -> (i32, i32) {
    %c0_i32 = arith.constant 0 : i32
    %c0_i32_0 = arith.constant 0 : i32
    return %arg0, %c0_i32 : i32, i32
  }
}

</mosaic_0001>

<bundles_post_ra>
// kernel: tpu_custom_call.1
= control target key start
LH: loop header
LB: loop body
LE: loop exit
PB: predicated region body
PF: predicated region fallthrough
CT: control target
= control target key end

     0   :  { %s3298_s0 = inlined_call_operand.vmem [shape: f32[8,784], index: 0, kind: input, shape index: {}]   ;;  %s3299_s1 = inlined_call_operand.vmem [shape: f32[784,128], index: 1, kind: input, shape index: {}]   ;;  %s3300_s2 = inlined_call_operand.vmem [shape: f32[1,128], index: 2, kind: input, shape index: {}]   ;;  %s3301_s3 = inlined_call_operand.vmem [shape: f32[128,64], index: 3, kind: input, shape index: {}]   ;;  %s3302_s4 = inlined_call_operand.vmem [shape: f32[1,64], index: 4, kind: input, shape index: {}]   ;;  %s3303_s5 = inlined_call_operand.vmem [shape: f32[64,12], index: 5, kind: input, shape index: {}]   ;;  %s3304_s6 = inlined_call_operand.vmem [shape: f32[1,12], index: 6, kind: input, shape index: {}]   ;;  %s3305_s7 = inlined_call_operand.vmem [shape: f32[12,128], index: 7, kind: input, shape index: {}]   ;;  %s3306_s8 = inlined_call_operand.vmem [shape: f32[1,128], index: 8, kind: input, shape index: {}]   ;;  %s3307_s9 = inlined_call_operand.vmem [shape: f32[128,12], index: 9, kind: input, shape index: {}]   ;;  %s3308_s10 = inlined_call_operand.vmem [shape: f32[1,12], index: 10, kind: input, shape index: {}]   ;;  %s3309_s11 = inlined_call_operand.vmem [shape: f32[12,64], index: 11, kind: input, shape index: {}]   ;;  %s3310_s12 = inlined_call_operand.vmem [shape: f32[1,64], index: 12, kind: input, shape index: {}]   ;;  %s3311_s13 = inlined_call_operand.vmem [shape: f32[64,128], index: 13, kind: input, shape index: {}]   ;;  %s3312_s14 = inlined_call_operand.vmem [shape: f32[1,128], index: 14, kind: input, shape index: {}]   ;;  %s3313_s15 = inlined_call_operand.vmem [shape: f32[128,784], index: 15, kind: input, shape index: {}]   ;;  %s3314_s16 = inlined_call_operand.vmem [shape: f32[1,784], index: 16, kind: input, shape index: {}]   ;;  %s3315_s17 = inlined_call_operand.hbm [shape: f32[8,128], index: 17, kind: output, shape index: {0}]   ;;  %s3316_s18 = inlined_call_operand.hbm [shape: f32[8,784], index: 18, kind: output, shape index: {1}]  }
   0x1   :  { %3319 = sst [smem:[#allocation8_spill]] %s3298_s0 }
   0x2   :  { %3320 = sst [smem:[#allocation9_spill]] %s3299_s1 }
   0x3   :  { %3321 = sst [smem:[#allocation10_spill]] %s3300_s2 }
   0x4   :  { %24 = vsyncpa [#allocation3], 0  ;;  %s3322_s29 = sld [smem:[#allocation9_spill]]  ;;  %s3323_s23 = sld [smem:[#allocation8_spill]] }
   0xa   :  { %v83_v0 = vld [vmem:[%s3322_s29 + $0x80] sm:$0xff]  ;;  %v84_v1 = vld [vmem:[%s3322_s29 + $0x88] sm:$0xff]  ;;  %v85_v11 = vld [vmem:[%s3322_s29 + $0x90] sm:$0xff] }
   0xb   :  { %v67_v2 = vld [vmem:[%s3322_s29] sm:$0xff]  ;;  %v1875_v3 = vpack.c.bf16 %v84_v1, %v83_v0  ;;  %v68_v4 = vld [vmem:[%s3322_s29 + $0x8] sm:$0xff]  ;;  %v86_v13 = vld [vmem:[%s3322_s29 + $0x98] sm:$0xff] }
   0xc   :  { %v115_v5 = vld [vmem:[%s3322_s29 + $0x180] sm:$0xff]  ;;  %v116_v6 = vld [vmem:[%s3322_s29 + $0x188] sm:$0xff]  ;;  %v1877_v7 = vpack.c.bf16 %v68_v4, %v67_v2  ;;  %v69_v14 = vld [vmem:[%s3322_s29 + $0x10] sm:$0xff]  ;;  %v1879_v16 = vpack.c.bf16 %v86_v13, %v85_v11 }
   0xd   :  { %v1907_v8 = vpack.c.bf16 %v116_v6, %v115_v5  ;;  %v99_v9 = vld [vmem:[%s3322_s29 + $0x100] sm:$0xff]  ;;  %v100_v10 = vld [vmem:[%s3322_s29 + $0x108] sm:$0xff]  ;;  %1876 = vmatprep.subr.bf16.mxu0 %v1875_v3  ;;  %v70_v15 = vld [vmem:[%s3322_s29 + $0x18] sm:$0xff] }
   0xe   :  { %v1909_v12 = vpack.c.bf16 %v100_v10, %v99_v9  ;;  %1878 = vmatpush3.bf16.msra.mxu0 %v1877_v7  ;;  %v1881_v17 = vpack.c.bf16 %v70_v15, %v69_v14  ;;  %v117_v18 = vld [vmem:[%s3322_s29 + $0x190] sm:$0xff]  ;;  %v118_v19 = vld [vmem:[%s3322_s29 + $0x198] sm:$0xff]  ;;  %v87_v23 = vld [vmem:[%s3322_s29 + $0xa0] sm:$0xff] }
   0xf   :  { %1908 = vmatprep.subr.bf16.mxu1 %v1907_v8  ;;  %v101_v20 = vld [vmem:[%s3322_s29 + $0x110] sm:$0xff]  ;;  %v1911_v21 = vpack.c.bf16 %v118_v19, %v117_v18  ;;  %v102_v22 = vld [vmem:[%s3322_s29 + $0x118] sm:$0xff]  ;;  %v88_v24 = vld [vmem:[%s3322_s29 + $0xa8] sm:$0xff]  ;;  %1880 = vmatprep.subr.bf16.mxu0 %v1879_v16 }
  0x10   :  { %1910 = vmatpush3.bf16.msra.mxu1 %v1909_v12  ;;  %v1913_v25 = vpack.c.bf16 %v102_v22, %v101_v20  ;;  %v1883_v26 = vpack.c.bf16 %v88_v24, %v87_v23  ;;  %v71_v27 = vld [vmem:[%s3322_s29 + $0x20] sm:$0xff]  ;;  %v72_v28 = vld [vmem:[%s3322_s29 + $0x28] sm:$0xff]  ;;  %v89_v35 = vld [vmem:[%s3322_s29 + $0xb0] sm:$0xff] }
  0x11   :  { %v119_v29 = vld [vmem:[%s3322_s29 + $0x1a0] sm:$0xff]  ;;  %1912 = vmatprep.subr.bf16.mxu1 %v1911_v21  ;;  %v120_v30 = vld [vmem:[%s3322_s29 + $0x1a8] sm:$0xff]  ;;  %v1885_v33 = vpack.c.bf16 %v72_v28, %v71_v27  ;;  %v90_v36 = vld [vmem:[%s3322_s29 + $0xb8] sm:$0xff] }
  0x12   :  { %v103_v31 = vld [vmem:[%s3322_s29 + $0x120] sm:$0xff]  ;;  %v104_v32 = vld [vmem:[%s3322_s29 + $0x128] sm:$0xff]  ;;  %1882 = vmatpush3.bf16.msra.mxu0 %v1881_v17  ;;  %v1915_v34 = vpack.c.bf16 %v120_v30, %v119_v29  ;;  %v73_v37 = vld [vmem:[%s3322_s29 + $0x30] sm:$0xff]  ;;  %v1887_v39 = vpack.c.bf16 %v90_v36, %v89_v35 }
  0x13   :  { %1884 = vmatprep.subr.bf16.mxu0 %v1883_v26  ;;  %v1917_v38 = vpack.c.bf16 %v104_v32, %v103_v31  ;;  %v74_v40 = vld [vmem:[%s3322_s29 + $0x38] sm:$0xff]  ;;  %v121_v41 = vld [vmem:[%s3322_s29 + $0x1b0] sm:$0xff]  ;;  %v91_v46 = vld [vmem:[%s3322_s29 + $0xc0] sm:$0xff] }
  0x14   :  { %1914 = vmatpush3.bf16.msra.mxu1 %v1913_v25  ;;  %v122_v42 = vld [vmem:[%s3322_s29 + $0x1b8] sm:$0xff]  ;;  %v105_v44 = vld [vmem:[%s3322_s29 + $0x130] sm:$0xff]  ;;  %v92_v47 = vld [vmem:[%s3322_s29 + $0xc8] sm:$0xff]  ;;  %v1889_v48 = vpack.c.bf16 %v74_v40, %v73_v37 }
  0x15   :  { %1916 = vmatprep.subr.bf16.mxu1 %v1915_v34  ;;  %v1919_v43 = vpack.c.bf16 %v122_v42, %v121_v41  ;;  %v106_v45 = vld [vmem:[%s3322_s29 + $0x138] sm:$0xff]  ;;  %v123_v49 = vld [vmem:[%s3322_s29 + $0x1c0] sm:$0xff]  ;;  %v124_v50 = vld [vmem:[%s3322_s29 + $0x1c8] sm:$0xff]  ;;  %v1891_v52 = vpack.c.bf16 %v92_v47, %v91_v46 }
  0x16   :  { %1886 = vmatpush3.bf16.msra.mxu0 %v1885_v33  ;;  %v1921_v51 = vpack.c.bf16 %v106_v45, %v105_v44  ;;  %v75_v53 = vld [vmem:[%s3322_s29 + $0x40] sm:$0xff]  ;;  %v76_v54 = vld [vmem:[%s3322_s29 + $0x48] sm:$0xff]  ;;  %v1923_v56 = vpack.c.bf16 %v124_v50, %v123_v49  ;;  %v93_v58 = vld [vmem:[%s3322_s29 + $0xd0] sm:$0xff]  ;;  %v2268_v50 = vmov 0.0|0.0  }
  0x17   :  { %1888 = vmatprep.subr.bf16.mxu0 %v1887_v39  ;;  %v107_v55 = vld [vmem:[%s3322_s29 + $0x140] sm:$0xff]  ;;  %v108_v57 = vld [vmem:[%s3322_s29 + $0x148] sm:$0xff]  ;;  %v94_v59 = vld [vmem:[%s3322_s29 + $0xd8] sm:$0xff]  ;;  %v1893_v62 = vpack.c.bf16 %v76_v54, %v75_v53 }
  0x18   :  { %1918 = vmatpush3.bf16.msra.mxu1 %v1917_v38  ;;  %v125_v60 = vld [vmem:[%s3322_s29 + $0x1d0] sm:$0xff]  ;;  %v126_v61 = vld [vmem:[%s3322_s29 + $0x1d8] sm:$0xff]  ;;  %v1925_v63 = vpack.c.bf16 %v108_v57, %v107_v55  ;;  %v1895_v0 = vpack.c.bf16 %v94_v59, %v93_v58  ;;  %v95_v6 = vld [vmem:[%s3322_s29 + $0xe0] sm:$0xff] }
  0x19   :  { %1920 = vmatprep.subr.bf16.mxu1 %v1919_v43  ;;  %v77_v1 = vld [vmem:[%s3322_s29 + $0x50] sm:$0xff]  ;;  %v78_v2 = vld [vmem:[%s3322_s29 + $0x58] sm:$0xff]  ;;  %v1927_v4 = vpack.c.bf16 %v126_v61, %v125_v60  ;;  %v96_v7 = vld [vmem:[%s3322_s29 + $0xe8] sm:$0xff] }
  0x1a   :  { %1890 = vmatpush3.bf16.msra.mxu0 %v1889_v48  ;;  %v109_v3 = vld [vmem:[%s3322_s29 + $0x150] sm:$0xff]  ;;  %v110_v5 = vld [vmem:[%s3322_s29 + $0x158] sm:$0xff]  ;;  %v127_v8 = vld [vmem:[%s3322_s29 + $0x1e0] sm:$0xff]  ;;  %v1897_v10 = vpack.c.bf16 %v78_v2, %v77_v1  ;;  %v1899_v14 = vpack.c.bf16 %v96_v7, %v95_v6 }
  0x1b   :  { %1892 = vmatprep.subr.bf16.mxu0 %v1891_v52  ;;  %v128_v9 = vld [vmem:[%s3322_s29 + $0x1e8] sm:$0xff]  ;;  %v79_v11 = vld [vmem:[%s3322_s29 + $0x60] sm:$0xff]  ;;  %v1929_v13 = vpack.c.bf16 %v110_v5, %v109_v3  ;;  %v97_v19 = vld [vmem:[%s3322_s29 + $0xf0] sm:$0xff] }
  0x1c   :  { %1922 = vmatpush3.bf16.msra.mxu1 %v1921_v51  ;;  %v61_v12 = vld [vmem:[%s3323_s23 + $0x8] sm:$0xff]  ;;  %v111_v16 = vld [vmem:[%s3322_s29 + $0x160] sm:$0xff]  ;;  %v1931_v18 = vpack.c.bf16 %v128_v9, %v127_v8  ;;  %v98_v20 = vld [vmem:[%s3322_s29 + $0xf8] sm:$0xff] }
  0x1d   :  { %1924 = vmatprep.subr.bf16.mxu1 %v1923_v56  ;;  %v80_v15 = vld [vmem:[%s3322_s29 + $0x68] sm:$0xff]  ;;  %240 = vmatprep.mubr.f32.mxu0 %v61_v12  ;;  %v63_v21 = vld [vmem:[%s3323_s23 + $0x18] sm:$0xff]  ;;  %v129_v22 = vld [vmem:[%s3322_s29 + $0x1f0] sm:$0xff]  ;;  %v1903_v26 = vpack.c.bf16 %v98_v20, %v97_v19 }
  0x1e   :  { %1894 = vmatpush3.bf16.msra.mxu0 %v1893_v62  ;;  %v112_v17 = vld [vmem:[%s3322_s29 + $0x168] sm:$0xff]  ;;  %v130_v23 = vld [vmem:[%s3322_s29 + $0x1f8] sm:$0xff]  ;;  %310 = vmatprep.mubr.f32.mxu1 %v63_v21  ;;  %v1901_v24 = vpack.c.bf16 %v80_v15, %v79_v11  ;;  %v81_v27 = vld [vmem:[%s3322_s29 + $0x70] sm:$0xff] }
  0x1f   :  { %1896 = vmatprep.subr.bf16.mxu0 %v1895_v0  ;;  %v1933_v25 = vpack.c.bf16 %v112_v17, %v111_v16  ;;  %v82_v28 = vld [vmem:[%s3322_s29 + $0x78] sm:$0xff]  ;;  %v113_v29 = vld [vmem:[%s3322_s29 + $0x170] sm:$0xff]  ;;  %v1935_v30 = vpack.c.bf16 %v130_v23, %v129_v22  ;;  %v147_v32 = vld [vmem:[%s3322_s29 + $0x280] sm:$0xff] }
  0x20   :  { %1926 = vmatpush3.bf16.msra.mxu1 %v1925_v63  ;;  %v114_v31 = vld [vmem:[%s3322_s29 + $0x178] sm:$0xff]  ;;  %v148_v33 = vld [vmem:[%s3322_s29 + $0x288] sm:$0xff]  ;;  %v1905_v34 = vpack.c.bf16 %v82_v28, %v81_v27  ;;  %v131_v37 = vld [vmem:[%s3322_s29 + $0x200] sm:$0xff] }
  0x21   :  { %1928 = vmatprep.subr.bf16.mxu1 %v1927_v4  ;;  %v1937_v35 = vpack.c.bf16 %v114_v31, %v113_v29  ;;  %v1939_v36 = vpack.c.bf16 %v148_v33, %v147_v32  ;;  %v132_v38 = vld [vmem:[%s3322_s29 + $0x208] sm:$0xff]  ;;  %v149_v39 = vld [vmem:[%s3322_s29 + $0x290] sm:$0xff]  ;;  %v150_v40 = vld [vmem:[%s3322_s29 + $0x298] sm:$0xff] }
  0x22   :  { %1898 = vmatpush3.bf16.msra.mxu0 %v1897_v10  ;;  %v60_v41 = vld [vmem:[%s3323_s23] sm:$0xff]  ;;  %v1941_v42 = vpack.c.bf16 %v132_v38, %v131_v37  ;;  %v62_v43 = vld [vmem:[%s3323_s23 + $0x10] sm:$0xff]  ;;  %v1943_v45 = vpack.c.bf16 %v150_v40, %v149_v39  ;;  %v134_v46 = vld [vmem:[%s3322_s29 + $0x218] sm:$0xff] }
  0x23   :  { %1900 = vmatprep.subr.bf16.mxu0 %v1899_v14  ;;  %v133_v44 = vld [vmem:[%s3322_s29 + $0x210] sm:$0xff]  ;;  %v151_v47 = vld [vmem:[%s3322_s29 + $0x2a0] sm:$0xff]  ;;  %v152_v48 = vld [vmem:[%s3322_s29 + $0x2a8] sm:$0xff] }
  0x24   :  { %1930 = vmatpush3.bf16.msra.mxu1 %v1929_v13  ;;  %v65_v49 = vld [vmem:[%s3323_s23 + $0x28] sm:$0xff]  ;;  %v163_v51 = vld [vmem:[%s3322_s29 + $0x300] sm:$0xff] }
  0x25   :  { %1932 = vmatprep.subr.bf16.mxu1 %v1931_v18  ;;  %v164_v52 = vld [vmem:[%s3322_s29 + $0x308] sm:$0xff] }
  0x26   :  { %1902 = vmatpush3.bf16.msra.mxu0 %v1901_v24  ;;  %v1972_v53 = vpack.c.bf16 %v164_v52, %v163_v51 }
  0x27   :  { %1904 = vmatprep.subr.bf16.mxu0 %v1903_v26 }
  0x28   :  { %1934 = vmatpush3.bf16.msra.mxu1 %v1933_v25 }
  0x29   :  { %1936 = vmatprep.subr.bf16.mxu1 %v1935_v30 }
  0x2a   :  { %1906 = vmatpush3.bf16.msra.mxu0 %v1905_v34 }
  0x2b   :  { %1940 = vmatprep.subr.bf16.mxu0 %v1939_v36 }
  0x2c   :  { %1938 = vmatpush3.bf16.msra.mxu1 %v1937_v35 }
  0x2d   :  { %1971 = vmatprep.subr.bf16.mxu1 %v2268_v50  ;;  %241 = vmatmul.mubr.f32.vlgmr.msra.gmra.mrb[0].mxu0 %v60_v41 }
  0x2e   :  { %25 = vsyncpa [#allocation5], 0  ;;  %1942 = vmatpush3.bf16.msra.mxu0 %v1941_v42  ;;  %v1945_v54 = vpack.c.bf16 %v134_v46, %v133_v44  ;;  %v1947_v55 = vpack.c.bf16 %v152_v48, %v151_v47  ;;  %v135_v56 = vld [vmem:[%s3322_s29 + $0x220] sm:$0xff]  ;;  %v136_v57 = vld [vmem:[%s3322_s29 + $0x228] sm:$0xff]  ;;  %380 = vmatprep.mubr.f32.mxu0 %v65_v49  ;;  %vm2269_vm0 = vmmov 0   ;;  %v2270_v60 = vmov 0.0  }
  0x2f   :  { %311 = vmatmul.mubr.f32.vlgmr.msra.gmra.mrb[0].mxu1 %v62_v43  ;;  %1944 = vmatprep.subr.bf16.mxu0 %v1943_v45  ;;  %v153_v58 = vld [vmem:[%s3322_s29 + $0x2b0] sm:$0xff]  ;;  %v154_v59 = vld [vmem:[%s3322_s29 + $0x2b8] sm:$0xff]  ;;  %vm172_vm1 = vcmask 130048   ;;  %v1949_v62 = vpack.c.bf16 %v136_v57, %v135_v56  ;;  %v155_v2 = vld [vmem:[%s3322_s29 + $0x2c0] sm:$0xff]  ;;  %s3324_s27 = sld [smem:[#allocation10_spill]]  ;;  %vm566_vm2 = vcmask 523264  }
  0x30   :  { %1973 = vmatpush3.bf16.msra.mxu1 %v1972_v53  ;;  %1715 = vmatprep.mubr.msk.f32.mxu1 %vm2269_vm0, %v2270_v60  ;;  %v66_v61 = vld [vmem:[%s3323_s23 + $0x30] sm:$0xff]  ;;  %v1951_v63 = vpack.c.bf16 %v154_v59, %v153_v58  ;;  %v138_v1 = vld [vmem:[%s3322_s29 + $0x238] sm:$0xff]  ;;  %v156_v3 = vld [vmem:[%s3322_s29 + $0x2c8] sm:$0xff]  ;;  %vm654_vm3 = vcmask 1043456   ;;  %vm2271_vm4 = vmmov 1   ;;  %vm650_vm6 = vcmask 97280  }
  0x31   :  { %1974 = vmatprep.subr.bf16.mxu1 %v2268_v50  ;;  %v137_v0 = vld [vmem:[%s3322_s29 + $0x230] sm:$0xff]  ;;  %v1955_v5 = vpack.c.bf16 %v156_v3, %v155_v2  ;;  %v139_v6 = vld [vmem:[%s3322_s29 + $0x240] sm:$0xff]  ;;  %v140_v7 = vld [vmem:[%s3322_s29 + $0x248] sm:$0xff]  ;;  %s2272_s20 = smov [#allocation2]  }
  0x32   :  { %1946 = vmatpush3.bf16.msra.mxu0 %v1945_v54  ;;  %v1953_v4 = vpack.c.bf16 %v138_v1, %v137_v0  ;;  %v157_v8 = vld [vmem:[%s3322_s29 + $0x2d0] sm:$0xff]  ;;  %v158_v9 = vld [vmem:[%s3322_s29 + $0x2d8] sm:$0xff]  ;;  %v1957_v10 = vpack.c.bf16 %v140_v7, %v139_v6  ;;  %v159_v14 = vld [vmem:[%s3322_s29 + $0x2e0] sm:$0xff]  ;;  %s1485_s21 = sshll.u32 %s2272_s20, 4  ;;  %s1486_s21 = int_to_ptr.vmem [resolvable:$true] %s1485_s21 }
  0x33   :  { %1948 = vmatprep.subr.bf16.mxu0 %v1947_v55  ;;  %1716 = vmatmul.mubr.msk.f32.vlgmr.msra.gmra.mrb[2].mxu1 %vm172_vm1, %v66_v61  ;;  %v1959_v11 = vpack.c.bf16 %v158_v9, %v157_v8  ;;  %v141_v12 = vld [vmem:[%s3322_s29 + $0x250] sm:$0xff]  ;;  %v142_v13 = vld [vmem:[%s3322_s29 + $0x258] sm:$0xff]  ;;  %v160_v15 = vld [vmem:[%s3322_s29 + $0x2e8] sm:$0xff]  ;;  %s2220_s22 = scalar_lea.vmem %s1486_s21, 128  ;;  %p2225_p1 = scmp.lt.s32.totalorder %s1486_s21, %s1486_s21 }
  0x34   :  { %1750 = vmatprep.mubr.msk.f32.mxu1 %vm2269_vm0, %v2270_v60  ;;  %v1961_v16 = vpack.c.bf16 %v142_v13, %v141_v12  ;;  %v1963_v17 = vpack.c.bf16 %v160_v15, %v159_v14  ;;  %v143_v18 = vld [vmem:[%s3322_s29 + $0x260] sm:$0xff]  ;;  %v144_v19 = vld [vmem:[%s3322_s29 + $0x268] sm:$0xff]  ;;  %v161_v20 = vld [vmem:[%s3322_s29 + $0x2f0] sm:$0xff]  ;;  %p2221_p0 = scmp.ne.s32.totalorder %s1486_s21, %s2220_s22  ;;  %p2226_p2 = scmp.lt.s32.totalorder %s2220_s22, %s2220_s22 }
  0x35   :  { %v162_v21 = vld [vmem:[%s3322_s29 + $0x2f8] sm:$0xff]  ;;  %v1965_v22 = vpack.c.bf16 %v144_v19, %v143_v18  ;;  %v145_v24 = vld [vmem:[%s3322_s29 + $0x270] sm:$0xff]  ;;  %v64_v27 = vld [vmem:[%s3323_s23 + $0x20] sm:$0xff] }
  0x36   :  { %1950 = vmatpush3.bf16.msra.mxu0 %v1949_v62  ;;  %v1967_v23 = vpack.c.bf16 %v162_v21, %v161_v20  ;;  %v146_v25 = vld [vmem:[%s3322_s29 + $0x278] sm:$0xff]  ;;  %v457_v28 = vld [vmem:[%s3301_s3] sm:$0xff]  ;;  %v458_v29 = vld [vmem:[%s3301_s3 + $0x8] sm:$0xff]  ;;  %p2227_p3 = por %p2226_p2, %p2225_p1 }
  0x37   :  { %1952 = vmatprep.subr.bf16.mxu0 %v1951_v63  ;;  %v1969_v26 = vpack.c.bf16 %v146_v25, %v145_v24  ;;  %v459_v30 = vld [vmem:[%s3301_s3 + $0x10] sm:$0xff]  ;;  %v1975_v31 = vpack.c.bf16 %v458_v29, %v457_v28  ;;  %v460_v32 = vld [vmem:[%s3301_s3 + $0x18] sm:$0xff]  ;;  %v461_v34 = vld [vmem:[%s3301_s3 + $0x20] sm:$0xff] }
  0x38   :  { %v1978_v33 = vpack.c.bf16 %v460_v32, %v459_v30  ;;  %v462_v35 = vld [vmem:[%s3301_s3 + $0x28] sm:$0xff]  ;;  %v463_v37 = vld [vmem:[%s3301_s3 + $0x30] sm:$0xff]  ;;  %v464_v38 = vld [vmem:[%s3301_s3 + $0x38] sm:$0xff]  ;;  %p2228_p4 = pnand %p2227_p3, %p2221_p0 }
  0x39   :  { %1976 = vmatpush3.bf16.msra.mxu1 %v1975_v31  ;;  %v1981_v36 = vpack.c.bf16 %v462_v35, %v461_v34  ;;  %v1984_v39 = vpack.c.bf16 %v464_v38, %v463_v37  ;;  %v465_v40 = vld [vmem:[%s3301_s3 + $0x40] sm:$0xff]  ;;  %v466_v41 = vld [vmem:[%s3301_s3 + $0x48] sm:$0xff]  ;;  %v467_v43 = vld [vmem:[%s3301_s3 + $0x50] sm:$0xff] }
  0x3a   :  { %1954 = vmatpush3.bf16.msra.mxu0 %v1953_v4  ;;  %1977 = vmatprep.subr.bf16.mxu1 %v2268_v50  ;;  %v1987_v42 = vpack.c.bf16 %v466_v41, %v465_v40  ;;  %v468_v44 = vld [vmem:[%s3301_s3 + $0x58] sm:$0xff]  ;;  %v469_v46 = vld [vmem:[%s3301_s3 + $0x60] sm:$0xff]  ;;  %v470_v47 = vld [vmem:[%s3301_s3 + $0x68] sm:$0xff] }
  0x3b   :  { %1956 = vmatprep.subr.bf16.mxu0 %v1955_v5  ;;  %v1990_v45 = vpack.c.bf16 %v468_v44, %v467_v43  ;;  %v1993_v48 = vpack.c.bf16 %v470_v47, %v469_v46  ;;  %v471_v49 = vld [vmem:[%s3301_s3 + $0x70] sm:$0xff]  ;;  %v472_v51 = vld [vmem:[%s3301_s3 + $0x78] sm:$0xff]  ;;  %v551_v53 = vld [vmem:[%s3303_s5] sm:$0xff] }
  0x3c   :  { %v1996_v52 = vpack.c.bf16 %v472_v51, %v471_v49  ;;  %v552_v54 = vld [vmem:[%s3303_s5 + $0x8] sm:$0xff]  ;;  %v1507_v57 = vld [vmem:[%s3324_s27] ss:$0 sm:$0xff]  ;;  %vm2795_vm5 = vmpackc.low %vm654_vm3, %vm2271_vm4 }
  0x3d   :  { %1979 = vmatpush3.bf16.msra.mxu1 %v1978_v33  ;;  %v1999_v55 = vpack.c.bf16 %v552_v54, %v551_v53  ;;  %v555_v13 = vld [vmem:[%s3303_s5 + $0x20] sm:$0xff]  ;;  %v556_v14 = vld [vmem:[%s3303_s5 + $0x28] sm:$0xff]  ;;  %v730_v35 = vld [vmem:[%s3307_s9 + $0x10] sm:$0xff] }
  0x3e   :  { %1958 = vmatpush3.bf16.msra.mxu0 %v1957_v10  ;;  %1980 = vmatprep.subr.bf16.mxu1 %v2268_v50  ;;  %v553_v10 = vld [vmem:[%s3303_s5 + $0x10] sm:$0xff]  ;;  %v2005_v15 = vpack.c.bf16 %v556_v14, %v555_v13  ;;  %v1509_v19 = vld [vmem:[%s3302_s4] ss:$0 sm:$0xff]  ;;  %v642_v25 = vld [vmem:[%s3305_s7 + $0x8] sm:$0xf] }
  0x3f   :  { %1960 = vmatprep.subr.bf16.mxu0 %v1959_v11  ;;  %v554_v11 = vld [vmem:[%s3303_s5 + $0x18] sm:$0xff]  ;;  %v641_v24 = vld [vmem:[%s3305_s7] sm:$0xff]  ;;  %v729_v33 = vld [vmem:[%s3307_s9 + $0x8] sm:$0xff] }
  0x40   :  { %v2002_v12 = vpack.c.bf16 %v554_v11, %v553_v10  ;;  %v1510_v28 = vld [vmem:[%s3304_s6] ss:$0 sm:$0xff]  ;;  %v733_v40 = vld [vmem:[%s3307_s9 + $0x28] sm:$0xff]  ;;  %v735_v43 = vld [vmem:[%s3307_s9 + $0x38] sm:$0xff] }
  0x41   :  { %1982 = vmatpush3.bf16.msra.mxu1 %v1981_v36  ;;  %v728_v32 = vld [vmem:[%s3307_s9] sm:$0xff]  ;;  %v731_v36 = vld [vmem:[%s3307_s9 + $0x18] sm:$0xff]  ;;  %v737_v46 = vld [vmem:[%s3307_s9 + $0x48] sm:$0xff] }
  0x42   :  { %1962 = vmatpush3.bf16.msra.mxu0 %v1961_v16  ;;  %1983 = vmatprep.subr.bf16.mxu1 %v2268_v50  ;;  %v557_v16 = vld [vmem:[%s3303_s5 + $0x30] sm:$0xff]  ;;  %v2015_v34 = vpack.c.bf16 %v729_v33, %v728_v32  ;;  %v2018_v38 = vpack.c.bf16 %v731_v36, %v730_v35  ;;  %v739_v49 = vld [vmem:[%s3307_s9 + $0x58] sm:$0xff]  ;;  %v741_v53 = vld [vmem:[%s3307_s9 + $0x68] sm:$0xff] }
  0x43   :  { %1964 = vmatprep.subr.bf16.mxu0 %v1963_v17  ;;  %v558_v17 = vld [vmem:[%s3303_s5 + $0x38] sm:$0xff]  ;;  %v910_v10 = vld [vmem:[%s3311_s13 + $0x10] sm:$0xff]  ;;  %v912_v13 = vld [vmem:[%s3311_s13 + $0x20] sm:$0xff] }
  0x44   :  { %v2008_v18 = vpack.c.bf16 %v558_v17, %v557_v16  ;;  %v911_v11 = vld [vmem:[%s3311_s13 + $0x18] sm:$0xff]  ;;  %v913_v14 = vld [vmem:[%s3311_s13 + $0x28] sm:$0xff]  ;;  %v914_v16 = vld [vmem:[%s3311_s13 + $0x30] sm:$0xff] }
  0x45   :  { %1985 = vmatpush3.bf16.msra.mxu1 %v1984_v39  ;;  %v732_v39 = vld [vmem:[%s3307_s9 + $0x20] sm:$0xff]  ;;  %v915_v17 = vld [vmem:[%s3311_s13 + $0x38] sm:$0xff]  ;;  %v1035_v35 = vld [vmem:[%s3313_s15 + $0x130] sm:$0xff] }
  0x46   :  { %1966 = vmatpush3.bf16.msra.mxu0 %v1965_v22  ;;  %1986 = vmatprep.subr.bf16.mxu1 %v2268_v50  ;;  %v2021_v41 = vpack.c.bf16 %v733_v40, %v732_v39  ;;  %v1020_v32 = vld [vmem:[%s3313_s15 + $0xb8] sm:$0xff]  ;;  %v1042_v40 = vld [vmem:[%s3313_s15 + $0x168] sm:$0xff] }
  0x47   :  { %1968 = vmatprep.subr.bf16.mxu0 %v1967_v23 }
  0x49   :  { %1988 = vmatpush3.bf16.msra.mxu1 %v1987_v42  ;;  %v734_v42 = vld [vmem:[%s3307_s9 + $0x30] sm:$0xff] }
  0x4a   :  { %1970 = vmatpush3.bf16.msra.mxu0 %v1969_v26  ;;  %1989 = vmatprep.subr.bf16.mxu1 %v2268_v50  ;;  %v2011_v26 = vpack.c.bf16 %v642_v25, %v641_v24  ;;  %v2024_v44 = vpack.c.bf16 %v735_v43, %v734_v42  ;;  %v999_v25 = vld [vmem:[%s3313_s15 + $0x10] sm:$0xff]  ;;  %v1041_v43 = vld [vmem:[%s3313_s15 + $0x160] sm:$0xff] }
  0x4b   :  { %1998 = vmatprep.subr.bf16.mxu0 %v2268_v50 }
  0x4d   :  { %381 = vmatmul.mubr.f32.vlgmr.msra.gmra.mrb[2].mxu0 %v64_v27  ;;  %1991 = vmatpush3.bf16.msra.mxu1 %v1990_v45  ;;  %v736_v45 = vld [vmem:[%s3307_s9 + $0x40] sm:$0xff] }
  0x4e   :  { %1769 = vmatprep.mubr.msk.f32.mxu0 %vm2269_vm0, %v2270_v60  ;;  %1992 = vmatprep.subr.bf16.mxu1 %v2268_v50  ;;  %v2027_v47 = vpack.c.bf16 %v737_v46, %v736_v45  ;;  %v1056_v46 = vld [vmem:[%s3313_s15 + $0x1d8] sm:$0xff] }
  0x4f   :  { %2000 = vmatpush3.bf16.msra.mxu0 %v1999_v55  ;;  %v742_v55 = vld [vmem:[%s3307_s9 + $0x70] sm:$0xff] }
  0x50   :  { %2001 = vmatprep.subr.bf16.mxu0 %v2268_v50 }
  0x51   :  { %1994 = vmatpush3.bf16.msra.mxu1 %v1993_v48  ;;  %v738_v48 = vld [vmem:[%s3307_s9 + $0x50] sm:$0xff] }
  0x52   :  { %1995 = vmatprep.subr.bf16.mxu1 %v2268_v50  ;;  %v2030_v51 = vpack.c.bf16 %v739_v49, %v738_v48  ;;  %v1055_v49 = vld [vmem:[%s3313_s15 + $0x1d0] sm:$0xff] }
  0x53   :  { %2003 = vmatpush3.bf16.msra.mxu0 %v2002_v12  ;;  %v2046_v12 = vpack.c.bf16 %v911_v11, %v910_v10  ;;  %v1047_v10 = vld [vmem:[%s3313_s15 + $0x190] sm:$0xff] }
  0x54   :  { %2004 = vmatprep.subr.bf16.mxu0 %v2268_v50 }
  0x55   :  { %1997 = vmatpush3.bf16.msra.mxu1 %v1996_v52  ;;  %v740_v52 = vld [vmem:[%s3307_s9 + $0x60] sm:$0xff] }
  0x56   :  { %2010 = vmatprep.subr.bf16.mxu1 %v2268_v50  ;;  %v2033_v54 = vpack.c.bf16 %v741_v53, %v740_v52  ;;  %v1516_v53 = vld [vmem:[%s3310_s12] ss:$0 sm:$0xff] }
  0x57   :  { %2006 = vmatpush3.bf16.msra.mxu0 %v2005_v15  ;;  %v2049_v15 = vpack.c.bf16 %v913_v14, %v912_v13  ;;  %v1039_v13 = vld [vmem:[%s3313_s15 + $0x150] sm:$0xff]  ;;  %v1046_v14 = vld [vmem:[%s3313_s15 + $0x188] sm:$0xff] }
  0x58   :  { %2007 = vmatprep.subr.bf16.mxu0 %v2268_v50 }
  0x5b   :  { %2009 = vmatpush3.bf16.msra.mxu0 %v2008_v18  ;;  %v2052_v18 = vpack.c.bf16 %v915_v17, %v914_v16  ;;  %v1061_v16 = vld [vmem:[%s3313_s15 + $0x200] sm:$0xff]  ;;  %v2068_v17 = vpack.c.bf16 %v1046_v14, %v1039_v13  ;;  %v1022_v13 = vld [vmem:[%s3313_s15 + $0xc8] sm:$0xff] }
  0x5c   :  { %2038 = vmatprep.subr.bf16.mxu0 %v2268_v50  ;;  %v1017_v14 = vld [vmem:[%s3313_s15 + $0xa0] sm:$0xff] }
 0x100   :  { %v1560_v56 = vpop.f32.mrb[0].mxu0 }
 0x101   :  { %v1561_v58 = vpop.f32.mrb[1].mxu0 }
 0x102   :  { %v1595_v59 = vpop.f32.mrb[0].mxu1  ;;  %v1562_v61 = vadd.f32 %v1561_v58, %v1560_v56  ;;  %v743_v56 = vld [vmem:[%s3307_s9 + $0x78] sm:$0xff]  ;;  %v1512_v58 = vld [vmem:[%s3306_s8] ss:$0 sm:$0xff] }
 0x103   :  { %v1596_v62 = vpop.f32.mrb[1].mxu1 }
 0x104   :  { %v1597_v63 = vadd.f32 %v1596_v62, %v1595_v59  ;;  %v243_v0 = vadd.f32 %v1562_v61, %v1507_v57  ;;  %v2036_v57 = vpack.c.bf16 %v743_v56, %v742_v55 }
 0x106   :  { %v313_v1 = vadd.f32 %v1597_v63, %v243_v0  ;;  %v452_v2 = vpop.f32.mrb[2].mxu1  ;;  %v822_v63 = vld [vmem:[%s3309_s11] sm:$0xff]  ;;  %v823_v0 = vld [vmem:[%s3309_s11 + $0x8] sm:$0xf] }
 0x107   :  { %v1717_v3 = vpop.f32.mrb[3].mxu1 }
 0x120   :  { %v1630_v4 = vpop.f32.mrb[2].mxu0 }
 0x121   :  { %v1631_v5 = vpop.f32.mrb[3].mxu0 }
 0x122   :  { %v1632_v6 = vadd.f32 %v1631_v5, %v1630_v4 }
 0x124   :  { %v383_v7 = vadd.f32 %v1632_v6, %v313_v1  ;;  %v2039_v1 = vpack.c.bf16 %v823_v0, %v822_v63  ;;  %v908_v6 = vld [vmem:[%s3311_s13] sm:$0xff]  ;;  %v1011_v0 = vld [vmem:[%s3313_s15 + $0x70] sm:$0xff] }
 0x126   :  { %v453_v8 = vadd.f32 %v452_v2, %v383_v7  ;;  %v1515_v2 = vld [vmem:[%s3308_s10] ss:$0 sm:$0xff]  ;;  %v909_v7 = vld [vmem:[%s3311_s13 + $0x8] sm:$0xff] }
 0x128   :  { %2180 = vtanh.f32 %v453_v8  ;;  %v2043_v8 = vpack.c.bf16 %v909_v7, %v908_v6  ;;  %v1025_v7 = vld [vmem:[%s3313_s15 + $0xe0] sm:$0xff] }
 0x132   :  { %v2181_v9 = vpop.eup %2180 }
 0x133   :  { %1751 = vmatmul.mubr.f32.vlgmr.msra.gmra.mrb[4].mxu1 %v2181_v9 }
 0x134   :  { %1776 = vmatprep.mubr.msk.f32.mxu1 %vm2269_vm0, %v2270_v60  ;;  %2013 = vmatpush3.bf16.msk.msra.mxu1 %vm2795_vm5, %v2011_v26  ;;  %v1006_v26 = vld [vmem:[%s3313_s15 + $0x48] sm:$0xff] }
 0x135   :  { %2014 = vmatprep.subr.bf16.mxu1 %v2268_v50  ;;  %v2088_v27 = vpack.c.bf16 %v1006_v26, %v999_v25  ;;  %v1077_v26 = vld [vmem:[%s3313_s15 + $0x280] sm:$0xff] }
 0x206   :  { %v546_v20 = vpop.f32.mrb[4].mxu1 }
 0x207   :  { %v547_v21 = vadd.f32 %v1509_v19, %v546_v20  ;;  %v1752_v22 = vpop.f32.mrb[5].mxu1  ;;  %v998_v19 = vld [vmem:[%s3313_s15 + $0x8] sm:$0xff]  ;;  %v1005_v20 = vld [vmem:[%s3313_s15 + $0x40] sm:$0xff] }
 0x208   :  { %v2054_v22 = vpack.c.bf16 %v1005_v20, %v998_v19  ;;  %v1053_v19 = vld [vmem:[%s3313_s15 + $0x1c0] sm:$0xff]  ;;  %v1060_v20 = vld [vmem:[%s3313_s15 + $0x1f8] sm:$0xff] }
 0x209   :  { %2182 = vtanh.f32 %v547_v21  ;;  %v1000_v21 = vld [vmem:[%s3313_s15 + $0x18] sm:$0xff] }
 0x213   :  { %v2183_v23 = vpop.eup %2182 }
 0x214   :  { %1770 = vmatmul.mubr.msk.f32.vlgmr.msra.gmra.mrb[4].mxu0 %vm566_vm2, %v2183_v23  ;;  %v1007_v23 = vld [vmem:[%s3313_s15 + $0x50] sm:$0xff] }
 0x215   :  { %1818 = vmatprep.mubr.msk.f32.mxu0 %vm2269_vm0, %v2270_v60  ;;  %2041 = vmatpush3.bf16.msk.msra.mxu0 %vm2795_vm5, %v2039_v1  ;;  %v2086_v24 = vpack.c.bf16 %v1007_v23, %v1000_v21  ;;  %v1018_v1 = vld [vmem:[%s3313_s15 + $0xa8] sm:$0xff]  ;;  %v2072_v21 = vpack.c.bf16 %v1060_v20, %v1053_v19  ;;  %v1075_v23 = vld [vmem:[%s3313_s15 + $0x270] sm:$0xff] }
 0x216   :  { %2042 = vmatprep.subr.bf16.mxu0 %v2268_v50 }
 0x2e7   :  { %v636_v29 = vpop.f32.mrb[4].mxu0 }
 0x2e8   :  { %v637_v30 = vadd.f32 %v1510_v28, %v636_v29  ;;  %v1771_v31 = vpop.f32.mrb[5].mxu0  ;;  %v1014_v28 = vld [vmem:[%s3313_s15 + $0x88] sm:$0xff]  ;;  %v1021_v29 = vld [vmem:[%s3313_s15 + $0xc0] sm:$0xff] }
 0x2e9   :  { %v1013_v31 = vld [vmem:[%s3313_s15 + $0x80] sm:$0xff] }
 0x2ea   :  { %2184 = vtanh.f32 %v637_v30  ;;  %v2090_v30 = vpack.c.bf16 %v1021_v29, %v1014_v28  ;;  %v2092_v33 = vpack.c.bf16 %v1020_v32, %v1013_v31  ;;  %v1074_v28 = vld [vmem:[%s3313_s15 + $0x268] sm:$0xff]  ;;  %v1069_v31 = vld [vmem:[%s3313_s15 + $0x240] sm:$0xff]  ;;  %v1076_v32 = vld [vmem:[%s3313_s15 + $0x278] sm:$0xff] }
 0x2f4   :  { %v2185_v37 = vpop.eup %2184 }
 0x2f5   :  { %1777 = vmatmul.mubr.msk.f32.vlgmr.msra.gmra.mrb[6].mxu1 %vm650_vm6, %v2185_v37  ;;  %v1027_v37 = vld [vmem:[%s3313_s15 + $0xf0] sm:$0xff] }
 0x2f6   :  { %2016 = vmatpush3.bf16.msra.mxu1 %v2015_v34  ;;  %1811 = vmatprep.mubr.msk.f32.mxu1 %vm2269_vm0, %v2270_v60  ;;  %v1028_v34 = vld [vmem:[%s3313_s15 + $0xf8] sm:$0xff] }
 0x2f7   :  { %2017 = vmatprep.subr.bf16.mxu1 %v2268_v50  ;;  %v2094_v36 = vpack.c.bf16 %v1035_v35, %v1028_v34  ;;  %v1082_v34 = vld [vmem:[%s3313_s15 + $0x2a8] sm:$0xff]  ;;  %v1089_v35 = vld [vmem:[%s3313_s15 + $0x2e0] sm:$0xff] }
 0x2fa   :  { %2019 = vmatpush3.bf16.msra.mxu1 %v2018_v38  ;;  %v1034_v38 = vld [vmem:[%s3313_s15 + $0x128] sm:$0xff] }
 0x2fb   :  { %2020 = vmatprep.subr.bf16.mxu1 %v2268_v50  ;;  %v2096_v39 = vpack.c.bf16 %v1034_v38, %v1027_v37  ;;  %v2078_v37 = vpack.c.bf16 %v1089_v35, %v1082_v34  ;;  %v1091_v38 = vld [vmem:[%s3313_s15 + $0x2f0] sm:$0xff]  ;;  %v1058_v34 = vld [vmem:[%s3313_s15 + $0x1e8] sm:$0xff]  ;;  %v1065_v35 = vld [vmem:[%s3313_s15 + $0x220] sm:$0xff] }
 0x2fe   :  { %2022 = vmatpush3.bf16.msra.mxu1 %v2021_v41  ;;  %v1049_v41 = vld [vmem:[%s3313_s15 + $0x1a0] sm:$0xff] }
 0x2ff   :  { %2023 = vmatprep.subr.bf16.mxu1 %v2268_v50  ;;  %v2098_v42 = vpack.c.bf16 %v1049_v41, %v1042_v40  ;;  %v1088_v40 = vld [vmem:[%s3313_s15 + $0x2d8] sm:$0xff] }
 0x302   :  { %2025 = vmatpush3.bf16.msra.mxu1 %v2024_v44  ;;  %v1048_v44 = vld [vmem:[%s3313_s15 + $0x198] sm:$0xff] }
 0x303   :  { %2026 = vmatprep.subr.bf16.mxu1 %v2268_v50  ;;  %v2100_v45 = vpack.c.bf16 %v1048_v44, %v1041_v43  ;;  %v1083_v43 = vld [vmem:[%s3313_s15 + $0x2b0] sm:$0xff]  ;;  %v1090_v44 = vld [vmem:[%s3313_s15 + $0x2e8] sm:$0xff] }
 0x306   :  { %2028 = vmatpush3.bf16.msra.mxu1 %v2027_v47  ;;  %v1063_v47 = vld [vmem:[%s3313_s15 + $0x210] sm:$0xff] }
 0x307   :  { %2029 = vmatprep.subr.bf16.mxu1 %v2268_v50  ;;  %v2102_v48 = vpack.c.bf16 %v1063_v47, %v1056_v46  ;;  %v2112_v46 = vpack.c.bf16 %v1090_v44, %v1083_v43  ;;  %v1103_v47 = vld [vmem:[%s3313_s15 + $0x350] sm:$0xff]  ;;  %v1072_v43 = vld [vmem:[%s3313_s15 + $0x258] sm:$0xff] }
 0x308   :  { %v1079_v44 = vld [vmem:[%s3313_s15 + $0x290] sm:$0xff] }
 0x30a   :  { %2031 = vmatpush3.bf16.msra.mxu1 %v2030_v51  ;;  %v1062_v51 = vld [vmem:[%s3313_s15 + $0x208] sm:$0xff] }
 0x30b   :  { %2032 = vmatprep.subr.bf16.mxu1 %v2268_v50  ;;  %v2104_v52 = vpack.c.bf16 %v1062_v51, %v1055_v49  ;;  %v1105_v49 = vld [vmem:[%s3313_s15 + $0x360] sm:$0xff] }
 0x30e   :  { %2034 = vmatpush3.bf16.msra.mxu1 %v2033_v54 }
 0x30f   :  { %2035 = vmatprep.subr.bf16.mxu1 %v2268_v50 }
 0x312   :  { %2037 = vmatpush3.bf16.msra.mxu1 %v2036_v57  ;;  %v997_v57 = vld [vmem:[%s3313_s15] sm:$0xff] }
 0x313   :  { %2087 = vmatprep.subr.bf16.mxu1 %v2086_v24  ;;  %v1070_v24 = vld [vmem:[%s3313_s15 + $0x248] sm:$0xff] }
 0x314   :  { %v2106_v29 = vpack.c.bf16 %v1077_v26, %v1070_v24  ;;  %v1031_v24 = vld [vmem:[%s3313_s15 + $0x110] sm:$0xff]  ;;  %v1044_v26 = vld [vmem:[%s3313_s15 + $0x178] sm:$0xff] }
 0x3c8   :  { %v724_v59 = vpop.f32.mrb[6].mxu1 }
 0x3c9   :  { %v725_v61 = vadd.f32 %v1512_v58, %v724_v59  ;;  %v1778_v62 = vpop.f32.mrb[7].mxu1  ;;  %v1004_v58 = vld [vmem:[%s3313_s15 + $0x38] sm:$0xff] }
 0x3ca   :  { %v1012_v59 = vld [vmem:[%s3313_s15 + $0x78] sm:$0xff]  ;;  %v2056_v62 = vpack.c.bf16 %v1004_v58, %v997_v57  ;;  %v1002_v58 = vld [vmem:[%s3313_s15 + $0x28] sm:$0xff] }
 0x3cb   :  { %1471 = vst [vmem:[#allocation2] sm:$0xff] %v725_v61  ;;  %1812 = vmatmul.mubr.f32.vlgmr.msra.gmra.mrb[8].mxu1 %v725_v61  ;;  %v1019_v61 = vld [vmem:[%s3313_s15 + $0xb0] sm:$0xff]  ;;  %v1104_v57 = vld [vmem:[%s3313_s15 + $0x358] sm:$0xff] }
 0x3cc   :  { %1281 = vmatprep.mubr.f32.mxu1 %v2270_v60  ;;  %2089 = vmatpush1.bf16.msra.mxu1 %v2088_v27  ;;  %v2058_v63 = vpack.c.bf16 %v1019_v61, %v1012_v59  ;;  %v1067_v27 = vld [vmem:[%s3313_s15 + $0x230] sm:$0xff]  ;;  %v1009_v59 = vld [vmem:[%s3313_s15 + $0x60] sm:$0xff] }
 0x3cd   :  { %2091 = vmatprep.subr.bf16.mxu1 %v2090_v30  ;;  %v2076_v30 = vpack.c.bf16 %v1074_v28, %v1067_v27  ;;  %v1051_v27 = vld [vmem:[%s3313_s15 + $0x1b0] sm:$0xff] }
 0x3d0   :  { %2093 = vmatpush1.bf16.msra.mxu1 %v2092_v33  ;;  %v2108_v33 = vpack.c.bf16 %v1076_v32, %v1069_v31  ;;  %v2130_v31 = vpack.c.bf16 %v1051_v27, %v1044_v26  ;;  %v1050_v32 = vld [vmem:[%s3313_s15 + $0x1a8] sm:$0xff] }
 0x3d1   :  { %2095 = vmatprep.subr.bf16.mxu1 %v2094_v36  ;;  %v1084_v36 = vld [vmem:[%s3313_s15 + $0x2b8] sm:$0xff] }
 0x3d2   :  { %v2110_v41 = vpack.c.bf16 %v1091_v38, %v1084_v36  ;;  %v1057_v38 = vld [vmem:[%s3313_s15 + $0x1e0] sm:$0xff] }
 0x3d4   :  { %2097 = vmatpush1.bf16.msra.mxu1 %v2096_v39  ;;  %v1081_v39 = vld [vmem:[%s3313_s15 + $0x2a0] sm:$0xff] }
 0x3d5   :  { %2099 = vmatprep.subr.bf16.mxu1 %v2098_v42  ;;  %v2080_v42 = vpack.c.bf16 %v1088_v40, %v1081_v39  ;;  %v2134_v39 = vpack.c.bf16 %v1065_v35, %v1058_v34  ;;  %v1064_v40 = vld [vmem:[%s3313_s15 + $0x218] sm:$0xff] }
 0x3d8   :  { %2101 = vmatpush1.bf16.msra.mxu1 %v2100_v45  ;;  %v1096_v45 = vld [vmem:[%s3313_s15 + $0x318] sm:$0xff] }
 0x3d9   :  { %2103 = vmatprep.subr.bf16.mxu1 %v2102_v48  ;;  %v1098_v48 = vld [vmem:[%s3313_s15 + $0x328] sm:$0xff]  ;;  %v2082_v51 = vpack.c.bf16 %v1103_v47, %v1096_v45  ;;  %v2136_v45 = vpack.c.bf16 %v1064_v40, %v1057_v38  ;;  %v1071_v47 = vld [vmem:[%s3313_s15 + $0x250] sm:$0xff] }
 0x3dc   :  { %2105 = vmatpush1.bf16.msra.mxu1 %v2104_v52  ;;  %v2114_v52 = vpack.c.bf16 %v1105_v49, %v1098_v48  ;;  %v2138_v48 = vpack.c.bf16 %v1079_v44, %v1072_v43  ;;  %v1078_v49 = vld [vmem:[%s3313_s15 + $0x288] sm:$0xff] }
 0x3dd   :  { %2107 = vmatprep.subr.bf16.mxu1 %v2106_v29 }
 0x3e0   :  { %2109 = vmatpush1.bf16.msra.mxu1 %v2108_v33  ;;  %v1052_v33 = vld [vmem:[%s3313_s15 + $0x1b8] sm:$0xff] }
 0x3e1   :  { %2111 = vmatprep.subr.bf16.mxu1 %v2110_v41  ;;  %v1059_v41 = vld [vmem:[%s3313_s15 + $0x1f0] sm:$0xff] }
 0x3e4   :  { %2113 = vmatpush1.bf16.msra.mxu1 %v2112_v46 }
 0x3e5   :  { %2115 = vmatprep.subr.bf16.mxu1 %v2114_v52  ;;  %v1080_v52 = vld [vmem:[%s3313_s15 + $0x298] sm:$0xff] }
 0x49e   :  { %v817_v3 = vpop.f32.mrb[8].mxu1 }
 0x49f   :  { %v818_v4 = vadd.f32 %v1515_v2, %v817_v3  ;;  %v1813_v5 = vpop.f32.mrb[9].mxu1  ;;  %v1026_v3 = vld [vmem:[%s3313_s15 + $0xe8] sm:$0xff] }
 0x4a0   :  { %v2060_v5 = vpack.c.bf16 %v1018_v1, %v1011_v0 }
 0x4a1   :  { %2186 = vtanh.f32 %v818_v4  ;;  %v1033_v4 = vld [vmem:[%s3313_s15 + $0x120] sm:$0xff] }
 0x4a2   :  { %v2062_v6 = vpack.c.bf16 %v1033_v4, %v1026_v3  ;;  %v1001_v3 = vld [vmem:[%s3313_s15 + $0x20] sm:$0xff]  ;;  %v1008_v4 = vld [vmem:[%s3313_s15 + $0x58] sm:$0xff] }
 0x4ab   :  { %v2187_v9 = vpop.eup %2186 }
 0x4ac   :  { %1819 = vmatmul.mubr.msk.f32.vlgmr.msra.gmra.mrb[6].mxu0 %vm650_vm6, %v2187_v9  ;;  %v1040_v9 = vld [vmem:[%s3313_s15 + $0x158] sm:$0xff] }
 0x4ad   :  { %2044 = vmatpush3.bf16.msra.mxu0 %v2043_v8  ;;  %1837 = vmatprep.mubr.msk.f32.mxu0 %vm2269_vm0, %v2270_v60  ;;  %v1032_v8 = vld [vmem:[%s3313_s15 + $0x118] sm:$0xff] }
 0x4ae   :  { %2045 = vmatprep.subr.bf16.mxu0 %v2268_v50  ;;  %v2064_v11 = vpack.c.bf16 %v1032_v8, %v1025_v7  ;;  %v1016_v7 = vld [vmem:[%s3313_s15 + $0x98] sm:$0xff]  ;;  %v1023_v8 = vld [vmem:[%s3313_s15 + $0xd0] sm:$0xff] }
 0x4b1   :  { %2047 = vmatpush3.bf16.msra.mxu0 %v2046_v12  ;;  %v2066_v12 = vpack.c.bf16 %v1047_v10, %v1040_v9  ;;  %v2120_v9 = vpack.c.bf16 %v1008_v4, %v1001_v3  ;;  %v1099_v3 = vld [vmem:[%s3313_s15 + $0x330] sm:$0xff] }
 0x4b2   :  { %2048 = vmatprep.subr.bf16.mxu0 %v2268_v50 }
 0x4b5   :  { %2050 = vmatpush3.bf16.msra.mxu0 %v2049_v15  ;;  %v1054_v15 = vld [vmem:[%s3313_s15 + $0x1c8] sm:$0xff] }
 0x4b6   :  { %2051 = vmatprep.subr.bf16.mxu0 %v2268_v50 }
 0x4b9   :  { %2053 = vmatpush3.bf16.msra.mxu0 %v2052_v18  ;;  %v2070_v18 = vpack.c.bf16 %v1061_v16, %v1054_v15  ;;  %v1024_v15 = vld [vmem:[%s3313_s15 + $0xd8] sm:$0xff] }
 0x4ba   :  { %2055 = vmatprep.subr.bf16.mxu0 %v2054_v22  ;;  %v1068_v22 = vld [vmem:[%s3313_s15 + $0x238] sm:$0xff]  ;;  %v2154_v20 = vpack.c.bf16 %v1024_v15, %v1017_v14 }
 0x4bb   :  { %v2074_v25 = vpack.c.bf16 %v1075_v23, %v1068_v22  ;;  %v1036_v23 = vld [vmem:[%s3313_s15 + $0x138] sm:$0xff] }
 0x57f   :  { %v903_v54 = vpop.f32.mrb[6].mxu0 }
 0x580   :  { %v904_v55 = vadd.f32 %v1516_v53, %v903_v54  ;;  %v1820_v56 = vpop.f32.mrb[7].mxu0  ;;  %v1095_v53 = vld [vmem:[%s3313_s15 + $0x310] sm:$0xff]  ;;  %v1102_v54 = vld [vmem:[%s3313_s15 + $0x348] sm:$0xff] }
 0x581   :  { %v2084_v56 = vpack.c.bf16 %v1102_v54, %v1095_v53  ;;  %v1086_v53 = vld [vmem:[%s3313_s15 + $0x2c8] sm:$0xff]  ;;  %v1093_v54 = vld [vmem:[%s3313_s15 + $0x300] sm:$0xff] }
 0x582   :  { %2188 = vtanh.f32 %v904_v55  ;;  %v1097_v55 = vld [vmem:[%s3313_s15 + $0x320] sm:$0xff] }
 0x583   :  { %v2116_v61 = vpack.c.bf16 %v1104_v57, %v1097_v55  ;;  %v2140_v55 = vpack.c.bf16 %v1078_v49, %v1071_v47  ;;  %v1085_v57 = vld [vmem:[%s3313_s15 + $0x2c0] sm:$0xff] }
 0x585   :  { %2117 = vmatpush1.bf16.msra.mxu1 %v2116_v61  ;;  %v1087_v61 = vld [vmem:[%s3313_s15 + $0x2d0] sm:$0xff] }
 0x586   :  { %2150 = vmatprep.subr.bf16.mxu1 %v2268_v50 }
 0x58c   :  { %v2189_v2 = vpop.eup %2188 }
 0x58d   :  { %1838 = vmatmul.mubr.msk.f32.vlgmr.msra.gmra.mrb[8].mxu0 %vm566_vm2, %v2189_v2 }
 0x58e   :  { %2057 = vmatpush1.bf16.msra.mxu0 %v2056_v62  ;;  %1210 = vmatprep.mubr.f32.mxu0 %v2270_v60  ;;  %v2118_v62 = vpack.c.bf16 %v1009_v59, %v1002_v58  ;;  %v2142_v58 = vpack.c.bf16 %v1093_v54, %v1086_v53  ;;  %v1092_v59 = vld [vmem:[%s3313_s15 + $0x2f8] sm:$0xff] }
 0x58f   :  { %2059 = vmatprep.subr.bf16.mxu0 %v2058_v63  ;;  %v1519_v63 = vld [vmem:[%s3312_s14] ss:$0 sm:$0xff] }
 0x592   :  { %2061 = vmatpush1.bf16.msra.mxu0 %v2060_v5  ;;  %v1003_v5 = vld [vmem:[%s3313_s15 + $0x30] sm:$0xff] }
 0x593   :  { %2063 = vmatprep.subr.bf16.mxu0 %v2062_v6  ;;  %v1010_v6 = vld [vmem:[%s3313_s15 + $0x68] sm:$0xff] }
 0x594   :  { %v2151_v10 = vpack.c.bf16 %v1010_v6, %v1003_v5  ;;  %v1106_v5 = vld [vmem:[%s3313_s15 + $0x368] sm:$0xff]  ;;  %v1101_v6 = vld [vmem:[%s3313_s15 + $0x340] sm:$0xff] }
 0x596   :  { %2065 = vmatpush1.bf16.msra.mxu0 %v2064_v11  ;;  %v1015_v11 = vld [vmem:[%s3313_s15 + $0x90] sm:$0xff] }
 0x597   :  { %2067 = vmatprep.subr.bf16.mxu0 %v2066_v12  ;;  %v2122_v12 = vpack.c.bf16 %v1023_v8, %v1016_v7  ;;  %v2124_v19 = vpack.c.bf16 %v1022_v13, %v1015_v11  ;;  %v1108_v7 = vld [vmem:[%s3313_s15 + $0x378] sm:$0xff]  ;;  %v2148_v8 = vpack.c.bf16 %v1106_v5, %v1099_v3 }
 0x59a   :  { %2069 = vmatpush1.bf16.msra.mxu0 %v2068_v17  ;;  %v1030_v17 = vld [vmem:[%s3313_s15 + $0x108] sm:$0xff] }
 0x59b   :  { %2071 = vmatprep.subr.bf16.mxu0 %v2070_v18  ;;  %v1037_v18 = vld [vmem:[%s3313_s15 + $0x140] sm:$0xff] }
 0x59c   :  { %v2126_v22 = vpack.c.bf16 %v1037_v18, %v1030_v17 }
 0x59e   :  { %2073 = vmatpush1.bf16.msra.mxu0 %v2072_v21  ;;  %v1029_v21 = vld [vmem:[%s3313_s15 + $0x100] sm:$0xff] }
 0x59f   :  { %2075 = vmatprep.subr.bf16.mxu0 %v2074_v25  ;;  %v1038_v25 = vld [vmem:[%s3313_s15 + $0x148] sm:$0xff]  ;;  %v2128_v28 = vpack.c.bf16 %v1036_v23, %v1029_v21 }
 0x5a0   :  { %v2157_v29 = vpack.c.bf16 %v1038_v25, %v1031_v24 }
 0x5a2   :  { %2077 = vmatpush1.bf16.msra.mxu0 %v2076_v30  ;;  %v1043_v30 = vld [vmem:[%s3313_s15 + $0x170] sm:$0xff] }
 0x5a3   :  { %2079 = vmatprep.subr.bf16.mxu0 %v2078_v37  ;;  %v2132_v36 = vpack.c.bf16 %v1050_v32, %v1043_v30 }
 0x5a6   :  { %2081 = vmatpush1.bf16.msra.mxu0 %v2080_v42  ;;  %v1066_v42 = vld [vmem:[%s3313_s15 + $0x228] sm:$0xff] }
 0x5a7   :  { %2083 = vmatprep.subr.bf16.mxu0 %v2082_v51  ;;  %v2163_v46 = vpack.c.bf16 %v1066_v42, %v1059_v41  ;;  %v1073_v51 = vld [vmem:[%s3313_s15 + $0x260] sm:$0xff] }
 0x5aa   :  { %2085 = vmatpush1.bf16.msra.mxu0 %v2084_v56  ;;  %v2166_v56 = vpack.c.bf16 %v1080_v52, %v1073_v51 }
 0x5ab   :  { %2119 = vmatprep.subr.bf16.mxu0 %v2118_v62  ;;  %v1094_v62 = vld [vmem:[%s3313_s15 + $0x308] sm:$0xff] }
 0x660   :  { %v992_v0 = vpop.f32.mrb[8].mxu0 }
 0x661   :  { %v993_v1 = vadd.f32 %v1519_v63, %v992_v0  ;;  %v1839_v2 = vpop.f32.mrb[9].mxu0  ;;  %v1100_v63 = vld [vmem:[%s3313_s15 + $0x338] sm:$0xff]  ;;  %v1107_v0 = vld [vmem:[%s3313_s15 + $0x370] sm:$0xff] }
 0x662   :  { %v2169_v2 = vpack.c.bf16 %v1094_v62, %v1087_v61  ;;  %v2146_v4 = vpack.c.bf16 %v1107_v0, %v1100_v63 }
 0x663   :  { %2190 = vtanh.f32 %v993_v1  ;;  %v2144_v1 = vpack.c.bf16 %v1092_v59, %v1085_v57 }
 0x66d   :  { %v3146_v16 = vpop.eup %2190 }
 0x66e   :  { %1211 = vmatmul.mubr.f32.vlgmr.msra.gmra.mrb[10].mxu0 %v3146_v16  ;;  %1282 = vmatmul.mubr.f32.vlgmr.msra.gmra.mrb[10].mxu1 %v3146_v16 }
 0x66f   :  { %2121 = vmatpush1.bf16.msra.mxu0 %v2120_v9  ;;  %2152 = vmatpush3.bf16.msra.mxu1 %v2151_v10  ;;  %v2172_v9 = vpack.c.bf16 %v1108_v7, %v1101_v6 }
 0x670   :  { %2123 = vmatprep.subr.bf16.mxu0 %v2122_v12  ;;  %2153 = vmatprep.subr.bf16.mxu1 %v2268_v50 }
 0x671   :  { %1352 = vmatprep.mubr.f32.mxu0 %v2270_v60  ;;  %1872 = vmatprep.mubr.msk.f32.mxu1 %vm2269_vm0, %v2270_v60  ;;  %v1045_v60 = vld [vmem:[%s3313_s15 + $0x180] sm:$0xff] }
 0x672   :  { %v2160_v37 = vpack.c.bf16 %v1052_v33, %v1045_v60 }
 0x673   :  { %2125 = vmatpush1.bf16.msra.mxu0 %v2124_v19  ;;  %2155 = vmatpush3.bf16.msra.mxu1 %v2154_v20 }
 0x674   :  { %2127 = vmatprep.subr.bf16.mxu0 %v2126_v22  ;;  %2156 = vmatprep.subr.bf16.mxu1 %v2268_v50 }
 0x677   :  { %2129 = vmatpush1.bf16.msra.mxu0 %v2128_v28  ;;  %2158 = vmatpush3.bf16.msra.mxu1 %v2157_v29 }
 0x678   :  { %2131 = vmatprep.subr.bf16.mxu0 %v2130_v31  ;;  %2159 = vmatprep.subr.bf16.mxu1 %v2268_v50 }
 0x67b   :  { %2133 = vmatpush1.bf16.msra.mxu0 %v2132_v36  ;;  %2161 = vmatpush3.bf16.msra.mxu1 %v2160_v37 }
 0x67c   :  { %2135 = vmatprep.subr.bf16.mxu0 %v2134_v39  ;;  %2162 = vmatprep.subr.bf16.mxu1 %v2268_v50 }
 0x67f   :  { %2137 = vmatpush1.bf16.msra.mxu0 %v2136_v45  ;;  %2164 = vmatpush3.bf16.msra.mxu1 %v2163_v46 }
 0x680   :  { %2139 = vmatprep.subr.bf16.mxu0 %v2138_v48  ;;  %2165 = vmatprep.subr.bf16.mxu1 %v2268_v50 }
 0x683   :  { %2141 = vmatpush1.bf16.msra.mxu0 %v2140_v55  ;;  %2167 = vmatpush3.bf16.msra.mxu1 %v2166_v56 }
 0x684   :  { %2143 = vmatprep.subr.bf16.mxu0 %v2142_v58  ;;  %2168 = vmatprep.subr.bf16.mxu1 %v2268_v50 }
 0x687   :  { %2145 = vmatpush1.bf16.msra.mxu0 %v2144_v1  ;;  %2170 = vmatpush3.bf16.msra.mxu1 %v2169_v2 }
 0x688   :  { %2147 = vmatprep.subr.bf16.mxu0 %v2146_v4  ;;  %2171 = vmatprep.subr.bf16.mxu1 %v2268_v50 }
 0x68b   :  { %2149 = vmatpush1.bf16.msra.mxu0 %v2148_v8  ;;  %2173 = vmatpush3.bf16.msra.mxu1 %v2172_v9 }
 0x68e   :  { %1353 = vmatmul.mubr.f32.vlgmr.msra.gmra.mrb[12].mxu0 %v3146_v16  ;;  %1873 = vmatmul.mubr.f32.vlgmr.msra.gmra.mrb[12].mxu1 %v3146_v16 }
 0x68f   :  { %2231 = shalt.err (!%p2228_p4)
}
 0x690   :  { %s2232_s2 = scalar_lea.hbm %s3315_s17, 128 }
 0x691   :  { %p2233_p5 = scmp.ne.s32.totalorder %s3315_s17, %s2232_s2  ;;  %p2236_p6 = scmp.lt.u32.totalorder %s2232_s2, %s3315_s17 }
 0x693   :  { %p2238_p7 = pnand %p2236_p6, %p2233_p5 }
 0x695   :  { %2241 = shalt.err (!%p2238_p7)
}
 0x696   :  { %1488 = dma.vmem_to_hbm [thread:$0]  %s1486_s21, 128, %s3315_s17, [#allocation3]   ;;  %v1111_v50 = vlaneseq  ;;  %v1109_v13 = vld [vmem:[%s3314_s16] sm:$0x7f] }
 0x697   :  { %s2273_s16 = smov [#allocation4]  }
 0x698   :  { %v1112_v10 = vshrl.u32 %v1111_v50, 7  ;;  %s1495_s17 = sshll.u32 %s2273_s16, 4  ;;  %s1496_s17 = int_to_ptr.vmem [resolvable:$true] %s1495_s17 }
 0x699   :  { %s2242_s27 = scalar_lea.vmem %s1496_s17, 896  ;;  %p2247_p9 = scmp.lt.s32.totalorder %s1496_s17, %s1496_s17 }
 0x69a   :  { %v1113_v11 = vsub.s32 0, %v1112_v10  ;;  %v1121_v12 = vsub.s32 2, %v1112_v10  ;;  %v1117_v14 = vsub.s32 1, %v1112_v10  ;;  %v1125_v15 = vsub.s32 3, %v1112_v10  ;;  %p2243_p8 = scmp.ne.s32.totalorder %s1496_s17, %s2242_s27  ;;  %p2248_p10 = scmp.lt.s32.totalorder %s2242_s27, %s2242_s27 }
 0x69b   :  { %v1129_v39 = vsub.s32 4, %v1112_v10  ;;  %v1137_v40 = vsub.s32 6, %v1112_v10  ;;  %v1133_v41 = vsub.s32 5, %v1112_v10 }
 0x69c   :  { %v1114_v16 = vrot.slane %v1109_v13, %v1113_v11  ;;  %v1122_v17 = vrot.slane %v1109_v13, %v1121_v12  ;;  %v1118_v18 = vrot.slane %v1109_v13, %v1117_v14  ;;  %v1126_v19 = vrot.slane %v1109_v13, %v1125_v15  ;;  %p2249_p11 = por %p2248_p10, %p2247_p9 }
 0x69d   :  { %v1130_v44 = vrot.slane %v1109_v13, %v1129_v39  ;;  %v1138_v45 = vrot.slane %v1109_v13, %v1137_v40  ;;  %v1134_v47 = vrot.slane %v1109_v13, %v1133_v41 }
 0x69e   :  { %p2250_p12 = pnand %p2249_p11, %p2243_p8 }
 0x741   :  { %v1212_v20 = vpop.f32.mrb[10].mxu0  ;;  %v1283_v21 = vpop.f32.mrb[10].mxu1 }
 0x742   :  { %v1213_v22 = vadd.f32 %v1212_v20, %v1114_v16  ;;  %v1284_v23 = vadd.f32 %v1283_v21, %v1122_v17  ;;  %v1214_v24 = vpop.f32.mrb[11].mxu0  ;;  %v1285_v25 = vpop.f32.mrb[11].mxu1 }
 0x743   :  { %v1215_v26 = vadd.f32 %v1214_v24, %v1118_v18  ;;  %v1286_v27 = vadd.f32 %v1285_v25, %v1126_v19 }
 0x744   :  { %v1521_v28 = vmul.f32 -1.442695, %v1213_v22  ;;  %v1523_v29 = vmul.f32 -1.442695, %v1284_v23 }
 0x745   :  { %v1522_v30 = vmul.f32 -1.442695, %v1215_v26  ;;  %v1524_v31 = vmul.f32 -1.442695, %v1286_v27 }
 0x746   :  { %2192 = vpow2.f32 %v1521_v28 }
 0x747   :  { %2194 = vpow2.f32 %v1523_v29 }
 0x748   :  { %2196 = vpow2.f32 %v1522_v30 }
 0x749   :  { %2198 = vpow2.f32 %v1524_v31 }
 0x750   :  { %v2193_v32 = vpop.eup %2192 }
 0x751   :  { %v2195_v60 = vpop.eup %2194  ;;  %v1450_v33 = vadd.f32 1.0, %v2193_v32 }
 0x752   :  { %v2197_v34 = vpop.eup %2196  ;;  %v1452_v35 = vadd.f32 1.0, %v2195_v60 }
 0x753   :  { %v2199_v36 = vpop.eup %2198  ;;  %2200 = vrcp.f32 %v1450_v33  ;;  %v1451_v37 = vadd.f32 1.0, %v2197_v34 }
 0x754   :  { %2202 = vrcp.f32 %v1452_v35  ;;  %v1453_v38 = vadd.f32 1.0, %v2199_v36 }
 0x755   :  { %2204 = vrcp.f32 %v1451_v37 }
 0x756   :  { %2206 = vrcp.f32 %v1453_v38 }
 0x75d   :  { %v2201_v42 = vpop.eup %2200 }
 0x75e   :  { %v2203_v43 = vpop.eup %2202  ;;  %1472 = vst [vmem:[#allocation4] sm:$0xff] %v2201_v42 }
 0x75f   :  { %v2205_v46 = vpop.eup %2204  ;;  %1474 = vst [vmem:[#allocation4 + $0x10] sm:$0xff] %v2203_v43 }
 0x760   :  { %v2207_v48 = vpop.eup %2206  ;;  %1473 = vst [vmem:[#allocation4 + $0x8] sm:$0xff] %v2205_v46 }
 0x761   :  { %1475 = vst [vmem:[#allocation4 + $0x18] sm:$0xff] %v2207_v48  ;;  %v1354_v49 = vpop.f32.mrb[12].mxu0  ;;  %v1425_v51 = vpop.f32.mrb[12].mxu1 }
 0x762   :  { %v1355_v52 = vadd.f32 %v1354_v49, %v1130_v44  ;;  %v1426_v53 = vadd.f32 %v1425_v51, %v1138_v45  ;;  %v1356_v54 = vpop.f32.mrb[13].mxu0  ;;  %v1874_v55 = vpop.f32.mrb[13].mxu1 }
 0x763   :  { %v1357_v56 = vadd.f32 %v1356_v54, %v1134_v47 }
 0x764   :  { %v1525_v57 = vmul.f32 -1.442695, %v1355_v52  ;;  %v1527_v58 = vmul.f32 -1.442695, %v1426_v53 }
 0x765   :  { %v1526_v59 = vmul.f32 -1.442695, %v1357_v56 }
 0x766   :  { %2208 = vpow2.f32 %v1525_v57 }
 0x767   :  { %2210 = vpow2.f32 %v1527_v58 }
 0x768   :  { %2212 = vpow2.f32 %v1526_v59 }
 0x770   :  { %v2209_v61 = vpop.eup %2208 }
 0x771   :  { %v2211_v62 = vpop.eup %2210  ;;  %v1454_v63 = vadd.f32 1.0, %v2209_v61 }
 0x772   :  { %v2213_v0 = vpop.eup %2212  ;;  %v1456_v1 = vadd.f32 1.0, %v2211_v62 }
 0x773   :  { %2214 = vrcp.f32 %v1454_v63  ;;  %v1455_v2 = vadd.f32 1.0, %v2213_v0 }
 0x774   :  { %2216 = vrcp.f32 %v1456_v1 }
 0x775   :  { %2218 = vrcp.f32 %v1455_v2 }
 0x77d   :  { %v2215_v3 = vpop.eup %2214 }
 0x77e   :  { %v2217_v4 = vpop.eup %2216  ;;  %1476 = vst [vmem:[#allocation4 + $0x20] sm:$0xff] %v2215_v3 }
 0x77f   :  { %v2219_v5 = vpop.eup %2218  ;;  %1478 = vst.msk [vmem:[#allocation4 + $0x30] sm:$0xff] %vm172_vm1, %v2217_v4 }
 0x780   :  { %1477 = vst [vmem:[#allocation4 + $0x28] sm:$0xff] %v2219_v5 }
 0x781   :  { %2253 = shalt.err (!%p2250_p12)
}
 0x782   :  { %s2254_s13 = scalar_lea.hbm %s3316_s18, 896 }
 0x783   :  { %p2255_p13 = scmp.ne.s32.totalorder %s3316_s18, %s2254_s13  ;;  %p2258_p0 = scmp.lt.u32.totalorder %s2254_s13, %s3316_s18 }
 0x785   :  { %p2260_p1 = pnand %p2258_p0, %p2255_p13 }
 0x787   :  { %2263 = shalt.err (!%p2260_p1)
}
 0x788   :  { %1498 = dma.vmem_to_hbm [thread:$0]  %s1496_s17, 896, %s3316_s18, [#allocation5]  }
 0x789   :  { %2264 = dma.done.wait [#allocation3], 128  }
 0x78a   :  { %2265 = vsyncadd [#allocation3], 4294967168 }
 0x78b   :  { %2266 = dma.done.wait [#allocation5], 896  }
 0x78c   :  { %2267 = vsyncadd [#allocation5], 4294966400 }
 0x78d   :  { %1505 = vsyncpa [#allocation3], 1 }
 0x78e   :  { %1506 = vsyncpa [#allocation5], 1 }

</bundles_post_ra>
